<compile_context>
chip_gen: v6e
topology: v6e:2x2x1
jax: 0.10.0
libtpu: 0.0.40
codegen_flags: <defaults>
</compile_context>

<pallas_src>
import functools

import jax
import jax.numpy as jnp
from jax import lax
from jax.experimental import pallas as pl
from jax.experimental.pallas import tpu as pltpu

_LANE = 128
_SUBLANE = 8


def _round_up(n, m):
    return ((n + m - 1) // m) * m


def _lstm_fc_kernel(gx_ref, w_hh_ref, w_fc_ref, b_fc_ref, out_ref):
    """One batch tile: full recurrence over T + fused fc on the final h.

    gx_ref:   (T, BT, 4*Hp)  precomputed x @ W_ih + (b_ih + b_hh), time-major
    w_hh_ref: (Hp, 4*Hp)
    w_fc_ref: (Hp, Op)
    b_fc_ref: (1, Op)
    out_ref:  (BT, Op)
    """
    T, BT, _ = gx_ref.shape
    Hp = w_hh_ref.shape[0]

    # Loaded once, resident in VMEM for the whole serial loop.
    w_hh = w_hh_ref[...]
    mx_dtype = w_hh.dtype  # f32 by default; bf16 if params prepared that way

    def step(t, carry):
        h, c = carry
        # Single fused MXU matmul per step; f32 accumulation.
        gates = gx_ref[t] + jnp.dot(h.astype(mx_dtype), w_hh,
                                    preferred_element_type=jnp.float32)
        # Hp is a multiple of 128 -> every gate slice is whole lane groups.
        i_g = jax.nn.sigmoid(gates[:, 0 * Hp:1 * Hp])
        f_g = jax.nn.sigmoid(gates[:, 1 * Hp:2 * Hp])
        g_g = jnp.tanh(gates[:, 2 * Hp:3 * Hp])
        o_g = jax.nn.sigmoid(gates[:, 3 * Hp:4 * Hp])
        c_new = f_g * c + i_g * g_g        # padded lanes stay exactly 0
        h_new = o_g * jnp.tanh(c_new)
        return h_new, c_new

    h0 = jnp.zeros((BT, Hp), jnp.float32)
    c0 = jnp.zeros((BT, Hp), jnp.float32)
    hT, _ = lax.fori_loop(0, T, step, (h0, c0),
                          unroll=True if T <= 32 else 8)

    # Fused fc on the final hidden state; Op is lane-dense (multiple of 128).
    out_ref[...] = (jnp.dot(hT.astype(w_fc_ref.dtype), w_fc_ref[...],
                            preferred_element_type=jnp.float32)
                    + b_fc_ref[...]).astype(out_ref.dtype)


def prepare_params(params, dtype=jnp.float32):
    """Pad / re-lay-out PyTorch-style params for the kernel (done once).

    params: w_ih (I,4H), w_hh (H,4H), b (4H,), w_fc (H,O), b_fc (O,), gates [i,f,g,o].
    Each gate's H columns are placed at a 128-lane-aligned offset (k*Hp); padded
    rows/cols are zero so padded hidden lanes remain exactly zero through time.
    """
    H = params["w_hh"].shape[0]
    O = params["w_fc"].shape[1]
    Hp = _round_up(H, _LANE)
    Op = _round_up(O, _LANE)

    def pad_gate_cols(w):  # (rows, 4H) -> (rows, 4Hp)
        rows = w.shape[0]
        out = jnp.zeros((rows, 4 * Hp), dtype)
        for k in range(4):
            out = out.at[:, k * Hp:k * Hp + H].set(
                w[:, k * H:(k + 1) * H].astype(dtype))
        return out

    w_ih_p = pad_gate_cols(params["w_ih"])                              # (I, 4Hp)
    w_hh_p = jnp.zeros((Hp, 4 * Hp), dtype).at[:H, :].set(
        pad_gate_cols(params["w_hh"]))                                  # (Hp, 4Hp)
    b_p = pad_gate_cols(params["b"].reshape(1, 4 * H))[0]               # (4Hp,)
    w_fc_p = jnp.zeros((Hp, Op), dtype).at[:H, :O].set(
        params["w_fc"].astype(dtype))                                   # (Hp, Op)
    b_fc_p = jnp.zeros((1, Op), jnp.float32).at[0, :O].set(
        params["b_fc"].astype(jnp.float32))                             # (1, Op)
    return {"w_ih_p": w_ih_p, "w_hh_p": w_hh_p, "b_p": b_p,
            "w_fc_p": w_fc_p, "b_fc_p": b_fc_p}


@functools.partial(jax.jit, static_argnames=("output_size",))
def lstm_model_forward(x, prep, *, output_size):
    """x: (B, T, I) batch_first like the PyTorch module. Returns (B, output_size)."""
    B, T, _ = x.shape
    Hp = prep["w_hh_p"].shape[0]
    Op = prep["w_fc_p"].shape[1]
    G = 4 * Hp

    # Batch: pad to a sublane multiple and tile for the "parallel" grid axis
    # (splits across TensorCores on v7x when the batch is large).
    Bp = _round_up(B, _SUBLANE)
    BT = min(Bp, 256)
    Bp = _round_up(Bp, BT)
    grid_b = Bp // BT
    xp = x if Bp == B else jnp.pad(x, ((0, Bp - B), (0, 0), (0, 0)))

    # Hoisted input projection: one big parallel matmul (no time dependence),
    # produced directly in time-major layout (no separate transpose pass).
    gates_x = (jnp.einsum("bti,ig->tbg",
                          xp.astype(prep["w_ih_p"].dtype), prep["w_ih_p"],
                          preferred_element_type=jnp.float32)
               + prep["b_p"].astype(jnp.float32)[None, None, :])        # (T, Bp, 4Hp)

    # NOTE: for large H/T, raise vmem_limit_bytes (v6e) and/or use bf16 params
    # (prepare_params(dtype=jnp.bfloat16)) so the resident weights + gates_x
    # slab fit v7x's 64 MiB VMEM.
    out_p = pl.pallas_call(
        _lstm_fc_kernel,
        out_shape=jax.ShapeDtypeStruct((Bp, Op), jnp.float32),
        grid=(grid_b,),
        in_specs=[
            pl.BlockSpec((T, BT, G), lambda b: (0, b, 0)),   # per-batch-tile slab
            pl.BlockSpec((Hp, G), lambda b: (0, 0)),         # w_hh (constant)
            pl.BlockSpec((Hp, Op), lambda b: (0, 0)),        # w_fc (constant)
            pl.BlockSpec((1, Op), lambda b: (0, 0)),         # b_fc (constant)
        ],
        out_specs=pl.BlockSpec((BT, Op), lambda b: (b, 0)),
        compiler_params=pltpu.CompilerParams(
            dimension_semantics=("parallel",)),
    )(gates_x, prep["w_hh_p"], prep["w_fc_p"], prep["b_fc_p"])

    return out_p[:B, :output_size]


def init_params(key, input_size, hidden_size, output_size):
    """Deterministic init; PyTorch-style U(-1/sqrt(H), 1/sqrt(H)). Natural shapes."""
    k = 1.0 / jnp.sqrt(jnp.float32(hidden_size))
    ks = jax.random.split(key, 6)
    u = lambda kk, shape: jax.random.uniform(kk, shape, jnp.float32, -k, k)
    w_ih = u(ks[0], (input_size, 4 * hidden_size))   # transposed vs torch (4H, I)
    w_hh = u(ks[1], (hidden_size, 4 * hidden_size))
    b_ih = u(ks[2], (4 * hidden_size,))
    b_hh = u(ks[3], (4 * hidden_size,))
    w_fc = u(ks[4], (hidden_size, output_size))
    b_fc = u(ks[5], (output_size,))
    return {"w_ih": w_ih, "w_hh": w_hh, "b": b_ih + b_hh,
            "w_fc": w_fc, "b_fc": b_fc}


def reference_forward(x, params):
    """Pure-JAX reference matching PyTorch nn.LSTM(batch_first=True) + fc."""
    B, T, _ = x.shape
    H = params["w_hh"].shape[0]

    def step(carry, x_t):
        h, c = carry
        gates = x_t @ params["w_ih"] + h @ params["w_hh"] + params["b"][None, :]
        i = jax.nn.sigmoid(gates[:, 0 * H:1 * H])
        f = jax.nn.sigmoid(gates[:, 1 * H:2 * H])
        g = jnp.tanh(gates[:, 2 * H:3 * H])
        o = jax.nn.sigmoid(gates[:, 3 * H:4 * H])
        c = f * c + i * g
        h = o * jnp.tanh(c)
        return (h, c), None

    h0 = jnp.zeros((B, H), jnp.float32)
    c0 = jnp.zeros((B, H), jnp.float32)
    (hT, _), _ = lax.scan(step, (h0, c0), jnp.transpose(x, (1, 0, 2)))
    return hT @ params["w_fc"] + params["b_fc"][None, :]


if __name__ == "__main__":
    batch, seq, input_size, hidden_size, output_size = 2, 8, 4, 32, 3

    key = jax.random.PRNGKey(0)
    k_x, k_p = jax.random.split(key)
    x = jax.random.normal(k_x, (batch, seq, input_size), jnp.float32)
    params = init_params(k_p, input_size, hidden_size, output_size)
    prep = prepare_params(params)  # one-time padded/gate-aligned layout

    out = lstm_model_forward(x, prep, output_size=output_size)
    out = jax.block_until_ready(out)

    ref = reference_forward(x, params)
    assert out.shape == (batch, output_size)
    assert jnp.allclose(out, ref, atol=1e-5, rtol=1e-5), (out, ref)

    print("KERNEL_OK")
</pallas_src>

<mosaic_0001>
module attributes {stable_mosaic.version = 11 : i64} {
  func.func @_lstm_fc_kernel(%arg0: i32, %arg1: memref<8x8x512xf32, #tpu.memory_space<vmem>>, %arg2: memref<128x512xf32, #tpu.memory_space<vmem>>, %arg3: memref<128x128xf32, #tpu.memory_space<vmem>>, %arg4: memref<1x128xf32, #tpu.memory_space<vmem>>, %arg5: memref<8x128xf32, #tpu.memory_space<vmem>>) attributes {dimension_semantics = [#tpu.dimension_semantics<parallel>], iteration_bounds = array<i64: 1>, scalar_prefetch = 0 : i64, scratch_operands = 0 : i64, tpu.core_type = #tpu.core_type<tc>, window_params = [{transform_indices = @transform_0, window_bounds = array<i64: 8, 8, 512>}, {pipeline_mode = #tpu.pipeline_mode<synchronous>, transform_indices = @transform_1, window_bounds = array<i64: 128, 512>}, {pipeline_mode = #tpu.pipeline_mode<synchronous>, transform_indices = @transform_2, window_bounds = array<i64: 128, 128>}, {pipeline_mode = #tpu.pipeline_mode<synchronous>, transform_indices = @transform_3, window_bounds = array<i64: 1, 128>}, {transform_indices = @transform_4, window_bounds = array<i64: 8, 128>}]} {
    %c0 = arith.constant 0 : index
    %c0_0 = arith.constant 0 : index
    %0 = vector.load %arg2[%c0, %c0_0] : memref<128x512xf32, #tpu.memory_space<vmem>>, vector<128x512xf32>
    %cst = arith.constant 0.000000e+00 : f32
    %1 = vector.broadcast %cst : f32 to vector<8x128xf32>
    %cst_1 = arith.constant 0.000000e+00 : f32
    %2 = vector.broadcast %cst_1 : f32 to vector<8x128xf32>
    %c0_i32 = arith.constant 0 : i32
    %3 = arith.index_cast %c0_i32 : i32 to index
    %c0_2 = arith.constant 0 : index
    %c0_3 = arith.constant 0 : index
    %4 = vector.load %arg1[%3, %c0_2, %c0_3] : memref<8x8x512xf32, #tpu.memory_space<vmem>>, vector<1x8x512xf32>
    %5 = vector.shape_cast %4 : vector<1x8x512xf32> to vector<8x512xf32>
    %cst_4 = arith.constant dense<0.000000e+00> : vector<8x512xf32>
    %6 = tpu.matmul %1, %0, %cst_4 {dimension_numbers = #tpu.dot_dimension_numbers<[1], [0], [0], [1], [0, 0, 1, 1], [], []>} : vector<8x128xf32>, vector<128x512xf32>, vector<8x512xf32> -> vector<8x512xf32>
    %7 = arith.addf %5, %6 : vector<8x512xf32>
    %8 = vector.extract_strided_slice %7 {offsets = [0, 0], sizes = [8, 128], strides = [1, 1]} : vector<8x512xf32> to vector<8x128xf32>
    %9 = arith.negf %8 : vector<8x128xf32>
    %10 = math.exp %9 : vector<8x128xf32>
    %cst_5 = arith.constant 1.000000e+00 : f32
    %11 = vector.broadcast %cst_5 : f32 to vector<8x128xf32>
    %12 = arith.addf %11, %10 : vector<8x128xf32>
    %13 = arith.divf %11, %12 : vector<8x128xf32>
    %14 = vector.extract_strided_slice %7 {offsets = [0, 128], sizes = [8, 128], strides = [1, 1]} : vector<8x512xf32> to vector<8x128xf32>
    %15 = arith.negf %14 : vector<8x128xf32>
    %16 = math.exp %15 : vector<8x128xf32>
    %cst_6 = arith.constant 1.000000e+00 : f32
    %17 = vector.broadcast %cst_6 : f32 to vector<8x128xf32>
    %18 = arith.addf %17, %16 : vector<8x128xf32>
    %19 = arith.divf %17, %18 : vector<8x128xf32>
    %20 = vector.extract_strided_slice %7 {offsets = [0, 256], sizes = [8, 128], strides = [1, 1]} : vector<8x512xf32> to vector<8x128xf32>
    %21 = math.tanh %20 : vector<8x128xf32>
    %22 = vector.extract_strided_slice %7 {offsets = [0, 384], sizes = [8, 128], strides = [1, 1]} : vector<8x512xf32> to vector<8x128xf32>
    %23 = arith.negf %22 : vector<8x128xf32>
    %24 = math.exp %23 : vector<8x128xf32>
    %cst_7 = arith.constant 1.000000e+00 : f32
    %25 = vector.broadcast %cst_7 : f32 to vector<8x128xf32>
    %26 = arith.addf %25, %24 : vector<8x128xf32>
    %27 = arith.divf %25, %26 : vector<8x128xf32>
    %28 = arith.mulf %19, %2 : vector<8x128xf32>
    %29 = arith.mulf %13, %21 : vector<8x128xf32>
    %30 = arith.addf %28, %29 : vector<8x128xf32>
    %31 = math.tanh %30 : vector<8x128xf32>
    %32 = arith.mulf %27, %31 : vector<8x128xf32>
    %c1_i32 = arith.constant 1 : i32
    %33 = arith.index_cast %c1_i32 : i32 to index
    %c0_8 = arith.constant 0 : index
    %c0_9 = arith.constant 0 : index
    %34 = vector.load %arg1[%33, %c0_8, %c0_9] : memref<8x8x512xf32, #tpu.memory_space<vmem>>, vector<1x8x512xf32>
    %35 = vector.shape_cast %34 : vector<1x8x512xf32> to vector<8x512xf32>
    %cst_10 = arith.constant dense<0.000000e+00> : vector<8x512xf32>
    %36 = tpu.matmul %32, %0, %cst_10 {dimension_numbers = #tpu.dot_dimension_numbers<[1], [0], [0], [1], [0, 0, 1, 1], [], []>} : vector<8x128xf32>, vector<128x512xf32>, vector<8x512xf32> -> vector<8x512xf32>
    %37 = arith.addf %35, %36 : vector<8x512xf32>
    %38 = vector.extract_strided_slice %37 {offsets = [0, 0], sizes = [8, 128], strides = [1, 1]} : vector<8x512xf32> to vector<8x128xf32>
    %39 = arith.negf %38 : vector<8x128xf32>
    %40 = math.exp %39 : vector<8x128xf32>
    %cst_11 = arith.constant 1.000000e+00 : f32
    %41 = vector.broadcast %cst_11 : f32 to vector<8x128xf32>
    %42 = arith.addf %41, %40 : vector<8x128xf32>
    %43 = arith.divf %41, %42 : vector<8x128xf32>
    %44 = vector.extract_strided_slice %37 {offsets = [0, 128], sizes = [8, 128], strides = [1, 1]} : vector<8x512xf32> to vector<8x128xf32>
    %45 = arith.negf %44 : vector<8x128xf32>
    %46 = math.exp %45 : vector<8x128xf32>
    %cst_12 = arith.constant 1.000000e+00 : f32
    %47 = vector.broadcast %cst_12 : f32 to vector<8x128xf32>
    %48 = arith.addf %47, %46 : vector<8x128xf32>
    %49 = arith.divf %47, %48 : vector<8x128xf32>
    %50 = vector.extract_strided_slice %37 {offsets = [0, 256], sizes = [8, 128], strides = [1, 1]} : vector<8x512xf32> to vector<8x128xf32>
    %51 = math.tanh %50 : vector<8x128xf32>
    %52 = vector.extract_strided_slice %37 {offsets = [0, 384], sizes = [8, 128], strides = [1, 1]} : vector<8x512xf32> to vector<8x128xf32>
    %53 = arith.negf %52 : vector<8x128xf32>
    %54 = math.exp %53 : vector<8x128xf32>
    %cst_13 = arith.constant 1.000000e+00 : f32
    %55 = vector.broadcast %cst_13 : f32 to vector<8x128xf32>
    %56 = arith.addf %55, %54 : vector<8x128xf32>
    %57 = arith.divf %55, %56 : vector<8x128xf32>
    %58 = arith.mulf %49, %30 : vector<8x128xf32>
    %59 = arith.mulf %43, %51 : vector<8x128xf32>
    %60 = arith.addf %58, %59 : vector<8x128xf32>
    %61 = math.tanh %60 : vector<8x128xf32>
    %62 = arith.mulf %57, %61 : vector<8x128xf32>
    %c2_i32 = arith.constant 2 : i32
    %63 = arith.index_cast %c2_i32 : i32 to index
    %c0_14 = arith.constant 0 : index
    %c0_15 = arith.constant 0 : index
    %64 = vector.load %arg1[%63, %c0_14, %c0_15] : memref<8x8x512xf32, #tpu.memory_space<vmem>>, vector<1x8x512xf32>
    %65 = vector.shape_cast %64 : vector<1x8x512xf32> to vector<8x512xf32>
    %cst_16 = arith.constant dense<0.000000e+00> : vector<8x512xf32>
    %66 = tpu.matmul %62, %0, %cst_16 {dimension_numbers = #tpu.dot_dimension_numbers<[1], [0], [0], [1], [0, 0, 1, 1], [], []>} : vector<8x128xf32>, vector<128x512xf32>, vector<8x512xf32> -> vector<8x512xf32>
    %67 = arith.addf %65, %66 : vector<8x512xf32>
    %68 = vector.extract_strided_slice %67 {offsets = [0, 0], sizes = [8, 128], strides = [1, 1]} : vector<8x512xf32> to vector<8x128xf32>
    %69 = arith.negf %68 : vector<8x128xf32>
    %70 = math.exp %69 : vector<8x128xf32>
    %cst_17 = arith.constant 1.000000e+00 : f32
    %71 = vector.broadcast %cst_17 : f32 to vector<8x128xf32>
    %72 = arith.addf %71, %70 : vector<8x128xf32>
    %73 = arith.divf %71, %72 : vector<8x128xf32>
    %74 = vector.extract_strided_slice %67 {offsets = [0, 128], sizes = [8, 128], strides = [1, 1]} : vector<8x512xf32> to vector<8x128xf32>
    %75 = arith.negf %74 : vector<8x128xf32>
    %76 = math.exp %75 : vector<8x128xf32>
    %cst_18 = arith.constant 1.000000e+00 : f32
    %77 = vector.broadcast %cst_18 : f32 to vector<8x128xf32>
    %78 = arith.addf %77, %76 : vector<8x128xf32>
    %79 = arith.divf %77, %78 : vector<8x128xf32>
    %80 = vector.extract_strided_slice %67 {offsets = [0, 256], sizes = [8, 128], strides = [1, 1]} : vector<8x512xf32> to vector<8x128xf32>
    %81 = math.tanh %80 : vector<8x128xf32>
    %82 = vector.extract_strided_slice %67 {offsets = [0, 384], sizes = [8, 128], strides = [1, 1]} : vector<8x512xf32> to vector<8x128xf32>
    %83 = arith.negf %82 : vector<8x128xf32>
    %84 = math.exp %83 : vector<8x128xf32>
    %cst_19 = arith.constant 1.000000e+00 : f32
    %85 = vector.broadcast %cst_19 : f32 to vector<8x128xf32>
    %86 = arith.addf %85, %84 : vector<8x128xf32>
    %87 = arith.divf %85, %86 : vector<8x128xf32>
    %88 = arith.mulf %79, %60 : vector<8x128xf32>
    %89 = arith.mulf %73, %81 : vector<8x128xf32>
    %90 = arith.addf %88, %89 : vector<8x128xf32>
    %91 = math.tanh %90 : vector<8x128xf32>
    %92 = arith.mulf %87, %91 : vector<8x128xf32>
    %c3_i32 = arith.constant 3 : i32
    %93 = arith.index_cast %c3_i32 : i32 to index
    %c0_20 = arith.constant 0 : index
    %c0_21 = arith.constant 0 : index
    %94 = vector.load %arg1[%93, %c0_20, %c0_21] : memref<8x8x512xf32, #tpu.memory_space<vmem>>, vector<1x8x512xf32>
    %95 = vector.shape_cast %94 : vector<1x8x512xf32> to vector<8x512xf32>
    %cst_22 = arith.constant dense<0.000000e+00> : vector<8x512xf32>
    %96 = tpu.matmul %92, %0, %cst_22 {dimension_numbers = #tpu.dot_dimension_numbers<[1], [0], [0], [1], [0, 0, 1, 1], [], []>} : vector<8x128xf32>, vector<128x512xf32>, vector<8x512xf32> -> vector<8x512xf32>
    %97 = arith.addf %95, %96 : vector<8x512xf32>
    %98 = vector.extract_strided_slice %97 {offsets = [0, 0], sizes = [8, 128], strides = [1, 1]} : vector<8x512xf32> to vector<8x128xf32>
    %99 = arith.negf %98 : vector<8x128xf32>
    %100 = math.exp %99 : vector<8x128xf32>
    %cst_23 = arith.constant 1.000000e+00 : f32
    %101 = vector.broadcast %cst_23 : f32 to vector<8x128xf32>
    %102 = arith.addf %101, %100 : vector<8x128xf32>
    %103 = arith.divf %101, %102 : vector<8x128xf32>
    %104 = vector.extract_strided_slice %97 {offsets = [0, 128], sizes = [8, 128], strides = [1, 1]} : vector<8x512xf32> to vector<8x128xf32>
    %105 = arith.negf %104 : vector<8x128xf32>
    %106 = math.exp %105 : vector<8x128xf32>
    %cst_24 = arith.constant 1.000000e+00 : f32
    %107 = vector.broadcast %cst_24 : f32 to vector<8x128xf32>
    %108 = arith.addf %107, %106 : vector<8x128xf32>
    %109 = arith.divf %107, %108 : vector<8x128xf32>
    %110 = vector.extract_strided_slice %97 {offsets = [0, 256], sizes = [8, 128], strides = [1, 1]} : vector<8x512xf32> to vector<8x128xf32>
    %111 = math.tanh %110 : vector<8x128xf32>
    %112 = vector.extract_strided_slice %97 {offsets = [0, 384], sizes = [8, 128], strides = [1, 1]} : vector<8x512xf32> to vector<8x128xf32>
    %113 = arith.negf %112 : vector<8x128xf32>
    %114 = math.exp %113 : vector<8x128xf32>
    %cst_25 = arith.constant 1.000000e+00 : f32
    %115 = vector.broadcast %cst_25 : f32 to vector<8x128xf32>
    %116 = arith.addf %115, %114 : vector<8x128xf32>
    %117 = arith.divf %115, %116 : vector<8x128xf32>
    %118 = arith.mulf %109, %90 : vector<8x128xf32>
    %119 = arith.mulf %103, %111 : vector<8x128xf32>
    %120 = arith.addf %118, %119 : vector<8x128xf32>
    %121 = math.tanh %120 : vector<8x128xf32>
    %122 = arith.mulf %117, %121 : vector<8x128xf32>
    %c4_i32 = arith.constant 4 : i32
    %123 = arith.index_cast %c4_i32 : i32 to index
    %c0_26 = arith.constant 0 : index
    %c0_27 = arith.constant 0 : index
    %124 = vector.load %arg1[%123, %c0_26, %c0_27] : memref<8x8x512xf32, #tpu.memory_space<vmem>>, vector<1x8x512xf32>
    %125 = vector.shape_cast %124 : vector<1x8x512xf32> to vector<8x512xf32>
    %cst_28 = arith.constant dense<0.000000e+00> : vector<8x512xf32>
    %126 = tpu.matmul %122, %0, %cst_28 {dimension_numbers = #tpu.dot_dimension_numbers<[1], [0], [0], [1], [0, 0, 1, 1], [], []>} : vector<8x128xf32>, vector<128x512xf32>, vector<8x512xf32> -> vector<8x512xf32>
    %127 = arith.addf %125, %126 : vector<8x512xf32>
    %128 = vector.extract_strided_slice %127 {offsets = [0, 0], sizes = [8, 128], strides = [1, 1]} : vector<8x512xf32> to vector<8x128xf32>
    %129 = arith.negf %128 : vector<8x128xf32>
    %130 = math.exp %129 : vector<8x128xf32>
    %cst_29 = arith.constant 1.000000e+00 : f32
    %131 = vector.broadcast %cst_29 : f32 to vector<8x128xf32>
    %132 = arith.addf %131, %130 : vector<8x128xf32>
    %133 = arith.divf %131, %132 : vector<8x128xf32>
    %134 = vector.extract_strided_slice %127 {offsets = [0, 128], sizes = [8, 128], strides = [1, 1]} : vector<8x512xf32> to vector<8x128xf32>
    %135 = arith.negf %134 : vector<8x128xf32>
    %136 = math.exp %135 : vector<8x128xf32>
    %cst_30 = arith.constant 1.000000e+00 : f32
    %137 = vector.broadcast %cst_30 : f32 to vector<8x128xf32>
    %138 = arith.addf %137, %136 : vector<8x128xf32>
    %139 = arith.divf %137, %138 : vector<8x128xf32>
    %140 = vector.extract_strided_slice %127 {offsets = [0, 256], sizes = [8, 128], strides = [1, 1]} : vector<8x512xf32> to vector<8x128xf32>
    %141 = math.tanh %140 : vector<8x128xf32>
    %142 = vector.extract_strided_slice %127 {offsets = [0, 384], sizes = [8, 128], strides = [1, 1]} : vector<8x512xf32> to vector<8x128xf32>
    %143 = arith.negf %142 : vector<8x128xf32>
    %144 = math.exp %143 : vector<8x128xf32>
    %cst_31 = arith.constant 1.000000e+00 : f32
    %145 = vector.broadcast %cst_31 : f32 to vector<8x128xf32>
    %146 = arith.addf %145, %144 : vector<8x128xf32>
    %147 = arith.divf %145, %146 : vector<8x128xf32>
    %148 = arith.mulf %139, %120 : vector<8x128xf32>
    %149 = arith.mulf %133, %141 : vector<8x128xf32>
    %150 = arith.addf %148, %149 : vector<8x128xf32>
    %151 = math.tanh %150 : vector<8x128xf32>
    %152 = arith.mulf %147, %151 : vector<8x128xf32>
    %c5_i32 = arith.constant 5 : i32
    %153 = arith.index_cast %c5_i32 : i32 to index
    %c0_32 = arith.constant 0 : index
    %c0_33 = arith.constant 0 : index
    %154 = vector.load %arg1[%153, %c0_32, %c0_33] : memref<8x8x512xf32, #tpu.memory_space<vmem>>, vector<1x8x512xf32>
    %155 = vector.shape_cast %154 : vector<1x8x512xf32> to vector<8x512xf32>
    %cst_34 = arith.constant dense<0.000000e+00> : vector<8x512xf32>
    %156 = tpu.matmul %152, %0, %cst_34 {dimension_numbers = #tpu.dot_dimension_numbers<[1], [0], [0], [1], [0, 0, 1, 1], [], []>} : vector<8x128xf32>, vector<128x512xf32>, vector<8x512xf32> -> vector<8x512xf32>
    %157 = arith.addf %155, %156 : vector<8x512xf32>
    %158 = vector.extract_strided_slice %157 {offsets = [0, 0], sizes = [8, 128], strides = [1, 1]} : vector<8x512xf32> to vector<8x128xf32>
    %159 = arith.negf %158 : vector<8x128xf32>
    %160 = math.exp %159 : vector<8x128xf32>
    %cst_35 = arith.constant 1.000000e+00 : f32
    %161 = vector.broadcast %cst_35 : f32 to vector<8x128xf32>
    %162 = arith.addf %161, %160 : vector<8x128xf32>
    %163 = arith.divf %161, %162 : vector<8x128xf32>
    %164 = vector.extract_strided_slice %157 {offsets = [0, 128], sizes = [8, 128], strides = [1, 1]} : vector<8x512xf32> to vector<8x128xf32>
    %165 = arith.negf %164 : vector<8x128xf32>
    %166 = math.exp %165 : vector<8x128xf32>
    %cst_36 = arith.constant 1.000000e+00 : f32
    %167 = vector.broadcast %cst_36 : f32 to vector<8x128xf32>
    %168 = arith.addf %167, %166 : vector<8x128xf32>
    %169 = arith.divf %167, %168 : vector<8x128xf32>
    %170 = vector.extract_strided_slice %157 {offsets = [0, 256], sizes = [8, 128], strides = [1, 1]} : vector<8x512xf32> to vector<8x128xf32>
    %171 = math.tanh %170 : vector<8x128xf32>
    %172 = vector.extract_strided_slice %157 {offsets = [0, 384], sizes = [8, 128], strides = [1, 1]} : vector<8x512xf32> to vector<8x128xf32>
    %173 = arith.negf %172 : vector<8x128xf32>
    %174 = math.exp %173 : vector<8x128xf32>
    %cst_37 = arith.constant 1.000000e+00 : f32
    %175 = vector.broadcast %cst_37 : f32 to vector<8x128xf32>
    %176 = arith.addf %175, %174 : vector<8x128xf32>
    %177 = arith.divf %175, %176 : vector<8x128xf32>
    %178 = arith.mulf %169, %150 : vector<8x128xf32>
    %179 = arith.mulf %163, %171 : vector<8x128xf32>
    %180 = arith.addf %178, %179 : vector<8x128xf32>
    %181 = math.tanh %180 : vector<8x128xf32>
    %182 = arith.mulf %177, %181 : vector<8x128xf32>
    %c6_i32 = arith.constant 6 : i32
    %183 = arith.index_cast %c6_i32 : i32 to index
    %c0_38 = arith.constant 0 : index
    %c0_39 = arith.constant 0 : index
    %184 = vector.load %arg1[%183, %c0_38, %c0_39] : memref<8x8x512xf32, #tpu.memory_space<vmem>>, vector<1x8x512xf32>
    %185 = vector.shape_cast %184 : vector<1x8x512xf32> to vector<8x512xf32>
    %cst_40 = arith.constant dense<0.000000e+00> : vector<8x512xf32>
    %186 = tpu.matmul %182, %0, %cst_40 {dimension_numbers = #tpu.dot_dimension_numbers<[1], [0], [0], [1], [0, 0, 1, 1], [], []>} : vector<8x128xf32>, vector<128x512xf32>, vector<8x512xf32> -> vector<8x512xf32>
    %187 = arith.addf %185, %186 : vector<8x512xf32>
    %188 = vector.extract_strided_slice %187 {offsets = [0, 0], sizes = [8, 128], strides = [1, 1]} : vector<8x512xf32> to vector<8x128xf32>
    %189 = arith.negf %188 : vector<8x128xf32>
    %190 = math.exp %189 : vector<8x128xf32>
    %cst_41 = arith.constant 1.000000e+00 : f32
    %191 = vector.broadcast %cst_41 : f32 to vector<8x128xf32>
    %192 = arith.addf %191, %190 : vector<8x128xf32>
    %193 = arith.divf %191, %192 : vector<8x128xf32>
    %194 = vector.extract_strided_slice %187 {offsets = [0, 128], sizes = [8, 128], strides = [1, 1]} : vector<8x512xf32> to vector<8x128xf32>
    %195 = arith.negf %194 : vector<8x128xf32>
    %196 = math.exp %195 : vector<8x128xf32>
    %cst_42 = arith.constant 1.000000e+00 : f32
    %197 = vector.broadcast %cst_42 : f32 to vector<8x128xf32>
    %198 = arith.addf %197, %196 : vector<8x128xf32>
    %199 = arith.divf %197, %198 : vector<8x128xf32>
    %200 = vector.extract_strided_slice %187 {offsets = [0, 256], sizes = [8, 128], strides = [1, 1]} : vector<8x512xf32> to vector<8x128xf32>
    %201 = math.tanh %200 : vector<8x128xf32>
    %202 = vector.extract_strided_slice %187 {offsets = [0, 384], sizes = [8, 128], strides = [1, 1]} : vector<8x512xf32> to vector<8x128xf32>
    %203 = arith.negf %202 : vector<8x128xf32>
    %204 = math.exp %203 : vector<8x128xf32>
    %cst_43 = arith.constant 1.000000e+00 : f32
    %205 = vector.broadcast %cst_43 : f32 to vector<8x128xf32>
    %206 = arith.addf %205, %204 : vector<8x128xf32>
    %207 = arith.divf %205, %206 : vector<8x128xf32>
    %208 = arith.mulf %199, %180 : vector<8x128xf32>
    %209 = arith.mulf %193, %201 : vector<8x128xf32>
    %210 = arith.addf %208, %209 : vector<8x128xf32>
    %211 = math.tanh %210 : vector<8x128xf32>
    %212 = arith.mulf %207, %211 : vector<8x128xf32>
    %c7_i32 = arith.constant 7 : i32
    %213 = arith.index_cast %c7_i32 : i32 to index
    %c0_44 = arith.constant 0 : index
    %c0_45 = arith.constant 0 : index
    %214 = vector.load %arg1[%213, %c0_44, %c0_45] : memref<8x8x512xf32, #tpu.memory_space<vmem>>, vector<1x8x512xf32>
    %215 = vector.shape_cast %214 : vector<1x8x512xf32> to vector<8x512xf32>
    %cst_46 = arith.constant dense<0.000000e+00> : vector<8x512xf32>
    %216 = tpu.matmul %212, %0, %cst_46 {dimension_numbers = #tpu.dot_dimension_numbers<[1], [0], [0], [1], [0, 0, 1, 1], [], []>} : vector<8x128xf32>, vector<128x512xf32>, vector<8x512xf32> -> vector<8x512xf32>
    %217 = arith.addf %215, %216 : vector<8x512xf32>
    %218 = vector.extract_strided_slice %217 {offsets = [0, 0], sizes = [8, 128], strides = [1, 1]} : vector<8x512xf32> to vector<8x128xf32>
    %219 = arith.negf %218 : vector<8x128xf32>
    %220 = math.exp %219 : vector<8x128xf32>
    %cst_47 = arith.constant 1.000000e+00 : f32
    %221 = vector.broadcast %cst_47 : f32 to vector<8x128xf32>
    %222 = arith.addf %221, %220 : vector<8x128xf32>
    %223 = arith.divf %221, %222 : vector<8x128xf32>
    %224 = vector.extract_strided_slice %217 {offsets = [0, 128], sizes = [8, 128], strides = [1, 1]} : vector<8x512xf32> to vector<8x128xf32>
    %225 = arith.negf %224 : vector<8x128xf32>
    %226 = math.exp %225 : vector<8x128xf32>
    %cst_48 = arith.constant 1.000000e+00 : f32
    %227 = vector.broadcast %cst_48 : f32 to vector<8x128xf32>
    %228 = arith.addf %227, %226 : vector<8x128xf32>
    %229 = arith.divf %227, %228 : vector<8x128xf32>
    %230 = vector.extract_strided_slice %217 {offsets = [0, 256], sizes = [8, 128], strides = [1, 1]} : vector<8x512xf32> to vector<8x128xf32>
    %231 = math.tanh %230 : vector<8x128xf32>
    %232 = vector.extract_strided_slice %217 {offsets = [0, 384], sizes = [8, 128], strides = [1, 1]} : vector<8x512xf32> to vector<8x128xf32>
    %233 = arith.negf %232 : vector<8x128xf32>
    %234 = math.exp %233 : vector<8x128xf32>
    %cst_49 = arith.constant 1.000000e+00 : f32
    %235 = vector.broadcast %cst_49 : f32 to vector<8x128xf32>
    %236 = arith.addf %235, %234 : vector<8x128xf32>
    %237 = arith.divf %235, %236 : vector<8x128xf32>
    %238 = arith.mulf %229, %210 : vector<8x128xf32>
    %239 = arith.mulf %223, %231 : vector<8x128xf32>
    %240 = arith.addf %238, %239 : vector<8x128xf32>
    %241 = math.tanh %240 : vector<8x128xf32>
    %242 = arith.mulf %237, %241 : vector<8x128xf32>
    %c8_i32 = arith.constant 8 : i32
    %c0_50 = arith.constant 0 : index
    %c0_51 = arith.constant 0 : index
    %243 = vector.load %arg3[%c0_50, %c0_51] : memref<128x128xf32, #tpu.memory_space<vmem>>, vector<128x128xf32>
    %cst_52 = arith.constant dense<0.000000e+00> : vector<8x128xf32>
    %244 = tpu.matmul %242, %243, %cst_52 {dimension_numbers = #tpu.dot_dimension_numbers<[1], [0], [0], [1], [0, 0, 1, 1], [], []>} : vector<8x128xf32>, vector<128x128xf32>, vector<8x128xf32> -> vector<8x128xf32>
    %c0_53 = arith.constant 0 : index
    %c0_54 = arith.constant 0 : index
    %245 = vector.load %arg4[%c0_53, %c0_54] : memref<1x128xf32, #tpu.memory_space<vmem>>, vector<1x128xf32>
    %246 = vector.broadcast %245 : vector<1x128xf32> to vector<8x128xf32>
    %247 = arith.addf %244, %246 : vector<8x128xf32>
    %c0_55 = arith.constant 0 : index
    %c0_56 = arith.constant 0 : index
    %248 = vector.load %arg5[%c0_55, %c0_56] : memref<8x128xf32, #tpu.memory_space<vmem>>, vector<8x128xf32>
    tpu.vector_store %arg5[%c0_55, %c0_56], %247 {strides = array<i32>} : memref<8x128xf32, #tpu.memory_space<vmem>>, vector<8x128xf32>,
    return
  }
  func.func @transform_0(%arg0: i32) -> (i32, i32, i32) {
    %c0_i32 = arith.constant 0 : i32
    %c0_i32_0 = arith.constant 0 : i32
    %c0_i32_1 = arith.constant 0 : i32
    return %c0_i32, %arg0, %c0_i32_0 : i32, i32, i32
  }
  func.func @transform_1(%arg0: i32) -> (i32, i32) {
    %c0_i32 = arith.constant 0 : i32
    %c0_i32_0 = arith.constant 0 : i32
    %c0_i32_1 = arith.constant 0 : i32
    return %c0_i32, %c0_i32_0 : i32, i32
  }
  func.func @transform_2(%arg0: i32) -> (i32, i32) {
    %c0_i32 = arith.constant 0 : i32
    %c0_i32_0 = arith.constant 0 : i32
    %c0_i32_1 = arith.constant 0 : i32
    return %c0_i32, %c0_i32_0 : i32, i32
  }
  func.func @transform_3(%arg0: i32) -> (i32, i32) {
    %c0_i32 = arith.constant 0 : i32
    %c0_i32_0 = arith.constant 0 : i32
    %c0_i32_1 = arith.constant 0 : i32
    return %c0_i32, %c0_i32_0 : i32, i32
  }
  func.func @transform_4(%arg0: i32) -> (i32, i32) {
    %c0_i32 = arith.constant 0 : i32
    %c0_i32_0 = arith.constant 0 : i32
    return %arg0, %c0_i32 : i32, i32
  }
}

</mosaic_0001>

<bundles_post_ra>
// kernel: lstm_model_forward.1
= control target key start
LH: loop header
LB: loop body
LE: loop exit
PB: predicated region body
PF: predicated region fallthrough
CT: control target
= control target key end

     0   :  { %9 = vsyncpa [#allocation3], 0  ;;  %s1917_s15 = smov [#allocation2]   ;;  %s2931_s0 = inlined_call_operand.vmem [shape: f32[8,8,512], index: 0, kind: input, shape index: {}]   ;;  %s2932_s1 = inlined_call_operand.hbm [shape: f32[128,512], index: 1, kind: input, shape index: {}]   ;;  %s2933_s2 = inlined_call_operand.vmem [shape: f32[128,128], index: 2, kind: input, shape index: {}]   ;;  %s2934_s3 = inlined_call_operand.vmem [shape: f32[1,128], index: 3, kind: input, shape index: {}]   ;;  %s2935_s4 = inlined_call_operand.vmem [shape: f32[8,128], index: 4, kind: output, shape index: {}]  }
   0x1   :  { %s17_s16 = sshll.u32 %s1917_s15, 4  ;;  %s18_s16 = int_to_ptr.vmem [resolvable:$true] %s17_s16 }
   0x2   :  { %s1903_s17 = scalar_lea.vmem %s18_s16, 8192  ;;  %p1908_p1 = scmp.lt.s32.totalorder %s18_s16, %s18_s16 }
   0x3   :  { %p1904_p0 = scmp.ne.s32.totalorder %s18_s16, %s1903_s17  ;;  %p1909_p2 = scmp.lt.s32.totalorder %s1903_s17, %s1903_s17 }
   0x5   :  { %p1910_p3 = por %p1909_p2, %p1908_p1 }
   0x7   :  { %p1911_p4 = pnand %p1910_p3, %p1904_p0 }
   0x9   :  { %1914 = shalt.err (!%p1911_p4)
}
   0xa   :  { %s1918_s18 = smov 512   ;;  %s1919_s19 = smov 32  }
   0xb   :  { %23 = dma.hbm_to_vmem [thread:$0]  %s2932_s1, 8192, %s18_s16, [#allocation3], %s1918_s18, %s1918_s18, %s1919_s19  }
   0xc   :  { %1915 = dma.done.wait [#allocation3], 8192  }
   0xd   :  { %1916 = vsyncadd [#allocation3], 4294959104  ;;  %v2938_v0 = vmov 0.0   ;;  %v1952_v1 = vld [vmem:[#allocation2 + $0x1e8] sm:$0xff]  ;;  %v1954_v2 = vld [vmem:[#allocation2 + $0x1e0] sm:$0xff]  ;;  %vm1921_vm0 = vmmov 0  }
   0xe   :  { %163 = vmatprep.mubr.f32.mxu0 %v2938_v0  ;;  %234 = vmatprep.mubr.f32.mxu1 %v2938_v0  ;;  %2999 = vst [vmem:[#allocation5_spill] sm:$0xff] %v1952_v1  ;;  %v1956_v3 = vld [vmem:[#allocation2 + $0x1c8] sm:$0xff]  ;;  %v1959_v4 = vld [vmem:[#allocation2 + $0x1c0] sm:$0xff]  ;;  %v1973_v9 = vld [vmem:[#allocation2 + $0x1f8] sm:$0xff] }
   0xf   :  { %99 = vmatprep.subr.mxu0 %v1952_v1  ;;  %v1962_v5 = vld [vmem:[#allocation2 + $0x1a8] sm:$0xff]  ;;  %v1965_v6 = vld [vmem:[#allocation2 + $0x1a0] sm:$0xff]  ;;  %3000 = vst [vmem:[#allocation6_spill] sm:$0xff] %v1973_v9  ;;  %170 = vmatprep.subr.mxu1 %v1973_v9  ;;  %v1979_v11 = vld [vmem:[#allocation2 + $0x1f0] sm:$0xff] }
  0x10   :  { %100 = vmatpush1.msra.mxu0 %v1954_v2  ;;  %v1968_v7 = vld [vmem:[#allocation2 + $0x188] sm:$0xff]  ;;  %v1971_v8 = vld [vmem:[#allocation2 + $0x180] sm:$0xff]  ;;  %171 = vmatpush1.msra.mxu1 %v1979_v11  ;;  %v1985_v13 = vld [vmem:[#allocation2 + $0x1d8] sm:$0xff] }
  0x11   :  { %101 = vmatprep.subr.mxu0 %v1956_v3  ;;  %v1976_v10 = vld [vmem:[#allocation2 + $0x168] sm:$0xff]  ;;  %v1982_v12 = vld [vmem:[#allocation2 + $0x160] sm:$0xff]  ;;  %v1987_v14 = vld [vmem:[#allocation2 + $0x1d0] sm:$0xff]  ;;  %172 = vmatprep.subr.mxu1 %v1985_v13 }
  0x12   :  { %102 = vmatpush1.msra.mxu0 %v1959_v4  ;;  %v1990_v15 = vld [vmem:[#allocation2 + $0x148] sm:$0xff]  ;;  %v1993_v16 = vld [vmem:[#allocation2 + $0x1b8] sm:$0xff]  ;;  %v1996_v17 = vld [vmem:[#allocation2 + $0x140] sm:$0xff]  ;;  %173 = vmatpush1.msra.mxu1 %v1987_v14 }
  0x13   :  { %103 = vmatprep.subr.mxu0 %v1962_v5  ;;  %v1999_v18 = vld [vmem:[#allocation2 + $0x1b0] sm:$0xff]  ;;  %v2001_v19 = vld [vmem:[#allocation2 + $0x198] sm:$0xff]  ;;  %v2004_v20 = vld [vmem:[#allocation2 + $0x128] sm:$0xff]  ;;  %174 = vmatprep.subr.mxu1 %v1993_v16 }
  0x14   :  { %104 = vmatpush1.msra.mxu0 %v1965_v6  ;;  %v2007_v21 = vld [vmem:[#allocation2 + $0x190] sm:$0xff]  ;;  %v2010_v22 = vld [vmem:[#allocation2 + $0x120] sm:$0xff]  ;;  %175 = vmatpush1.msra.mxu1 %v1999_v18  ;;  %v2013_v23 = vld [vmem:[#allocation2 + $0x178] sm:$0xff] }
  0x15   :  { %105 = vmatprep.subr.mxu0 %v1968_v7  ;;  %v2016_v24 = vld [vmem:[#allocation2 + $0x108] sm:$0xff]  ;;  %176 = vmatprep.subr.mxu1 %v2001_v19  ;;  %v2019_v25 = vld [vmem:[#allocation2 + $0x170] sm:$0xff]  ;;  %v2022_v26 = vld [vmem:[#allocation2 + $0x100] sm:$0xff] }
  0x16   :  { %106 = vmatpush1.msra.mxu0 %v1971_v8  ;;  %177 = vmatpush1.msra.mxu1 %v2007_v21  ;;  %v2025_v27 = vld [vmem:[#allocation2 + $0x158] sm:$0xff]  ;;  %v2028_v28 = vld [vmem:[#allocation2 + $0xe8] sm:$0xff]  ;;  %v2031_v29 = vld [vmem:[#allocation2 + $0x150] sm:$0xff] }
  0x17   :  { %107 = vmatprep.subr.mxu0 %v1976_v10  ;;  %178 = vmatprep.subr.mxu1 %v2013_v23  ;;  %v2034_v30 = vld [vmem:[#allocation2 + $0xe0] sm:$0xff]  ;;  %v2037_v31 = vld [vmem:[#allocation2 + $0x138] sm:$0xff]  ;;  %v2040_v32 = vld [vmem:[#allocation2 + $0xc8] sm:$0xff] }
  0x18   :  { %108 = vmatpush1.msra.mxu0 %v1982_v12  ;;  %179 = vmatpush1.msra.mxu1 %v2019_v25  ;;  %v2043_v33 = vld [vmem:[#allocation2 + $0x130] sm:$0xff]  ;;  %v2046_v34 = vld [vmem:[#allocation2 + $0xc0] sm:$0xff]  ;;  %v2049_v35 = vld [vmem:[#allocation2 + $0x118] sm:$0xff] }
  0x19   :  { %109 = vmatprep.subr.mxu0 %v1990_v15  ;;  %180 = vmatprep.subr.mxu1 %v2025_v27  ;;  %v2052_v36 = vld [vmem:[#allocation2 + $0xa8] sm:$0xff]  ;;  %v2055_v37 = vld [vmem:[#allocation2 + $0x110] sm:$0xff]  ;;  %v2058_v38 = vld [vmem:[#allocation2 + $0xa0] sm:$0xff] }
  0x1a   :  { %110 = vmatpush1.msra.mxu0 %v1996_v17  ;;  %181 = vmatpush1.msra.mxu1 %v2031_v29  ;;  %v2061_v39 = vld [vmem:[#allocation2 + $0xf8] sm:$0xff]  ;;  %v2064_v40 = vld [vmem:[#allocation2 + $0x88] sm:$0xff]  ;;  %v2067_v41 = vld [vmem:[#allocation2 + $0xf0] sm:$0xff] }
  0x1b   :  { %111 = vmatprep.subr.mxu0 %v2004_v20  ;;  %182 = vmatprep.subr.mxu1 %v2037_v31  ;;  %v2070_v42 = vld [vmem:[#allocation2 + $0x80] sm:$0xff]  ;;  %v2073_v43 = vld [vmem:[#allocation2 + $0xd8] sm:$0xff]  ;;  %v2076_v44 = vld [vmem:[#allocation2 + $0x68] sm:$0xff] }
  0x1c   :  { %112 = vmatpush1.msra.mxu0 %v2010_v22  ;;  %183 = vmatpush1.msra.mxu1 %v2043_v33  ;;  %3001 = vst [vmem:[#allocation7_spill] sm:$0xff] %v2076_v44  ;;  %v2079_v45 = vld [vmem:[#allocation2 + $0xd0] sm:$0xff]  ;;  %v2082_v46 = vld [vmem:[#allocation2 + $0x60] sm:$0xff]  ;;  %v2085_v47 = vld [vmem:[#allocation2 + $0xb8] sm:$0xff] }
  0x1d   :  { %113 = vmatprep.subr.mxu0 %v2016_v24  ;;  %184 = vmatprep.subr.mxu1 %v2049_v35  ;;  %3002 = vst [vmem:[#allocation8_spill] sm:$0xff] %v2082_v46  ;;  %v2088_v48 = vld [vmem:[#allocation2 + $0x48] sm:$0xff]  ;;  %v2091_v49 = vld [vmem:[#allocation2 + $0xb0] sm:$0xff]  ;;  %v2094_v50 = vld [vmem:[#allocation2 + $0x40] sm:$0xff] }
  0x1e   :  { %114 = vmatpush1.msra.mxu0 %v2022_v26  ;;  %185 = vmatpush1.msra.mxu1 %v2055_v37  ;;  %3003 = vst [vmem:[#allocation9_spill] sm:$0xff] %v2088_v48  ;;  %3004 = vst [vmem:[#allocation10_spill] sm:$0xff] %v2094_v50  ;;  %v2097_v51 = vld [vmem:[#allocation2 + $0x98] sm:$0xff]  ;;  %v2100_v52 = vld [vmem:[#allocation2 + $0x28] sm:$0xff] }
  0x1f   :  { %115 = vmatprep.subr.mxu0 %v2028_v28  ;;  %186 = vmatprep.subr.mxu1 %v2061_v39  ;;  %3005 = vst [vmem:[#allocation11_spill] sm:$0xff] %v2100_v52  ;;  %v2103_v53 = vld [vmem:[#allocation2 + $0x90] sm:$0xff]  ;;  %v2106_v54 = vld [vmem:[#allocation2 + $0x20] sm:$0xff]  ;;  %v2109_v55 = vld [vmem:[#allocation2 + $0x78] sm:$0xff] }
  0x20   :  { %116 = vmatpush1.msra.mxu0 %v2034_v30  ;;  %187 = vmatpush1.msra.mxu1 %v2067_v41  ;;  %3006 = vst [vmem:[#allocation12_spill] sm:$0xff] %v2103_v53  ;;  %3007 = vst [vmem:[#allocation13_spill] sm:$0xff] %v2106_v54  ;;  %v2112_v56 = vld [vmem:[#allocation2 + $0x8] sm:$0xff]  ;;  %v2115_v57 = vld [vmem:[#allocation2 + $0x70] sm:$0xff] }
  0x21   :  { %117 = vmatprep.subr.mxu0 %v2040_v32  ;;  %188 = vmatprep.subr.mxu1 %v2073_v43  ;;  %3008 = vst [vmem:[#allocation14_spill] sm:$0xff] %v2109_v55  ;;  %3009 = vst [vmem:[#allocation15_spill] sm:$0xff] %v2112_v56  ;;  %v2118_v58 = vld [vmem:[#allocation2] sm:$0xff]  ;;  %v2121_v59 = vld [vmem:[#allocation2 + $0x58] sm:$0xff] }
  0x22   :  { %118 = vmatpush1.msra.mxu0 %v2046_v34  ;;  %189 = vmatpush1.msra.mxu1 %v2079_v45  ;;  %3010 = vst [vmem:[#allocation16_spill] sm:$0xff] %v2115_v57  ;;  %3011 = vst [vmem:[#allocation17_spill] sm:$0xff] %v2118_v58  ;;  %v2125_v60 = vld [vmem:[#allocation2 + $0x50] sm:$0xff]  ;;  %v2129_v61 = vld [vmem:[#allocation2 + $0x38] sm:$0xff] }
  0x23   :  { %119 = vmatprep.subr.mxu0 %v2052_v36  ;;  %190 = vmatprep.subr.mxu1 %v2085_v47  ;;  %3012 = vst [vmem:[#allocation18_spill] sm:$0xff] %v2121_v59  ;;  %3013 = vst [vmem:[#allocation19_spill] sm:$0xff] %v2125_v60  ;;  %v2133_v62 = vld [vmem:[#allocation2 + $0x30] sm:$0xff]  ;;  %v2137_v63 = vld [vmem:[#allocation2 + $0x18] sm:$0xff] }
  0x24   :  { %120 = vmatpush1.msra.mxu0 %v2058_v38  ;;  %191 = vmatpush1.msra.mxu1 %v2091_v49  ;;  %3014 = vst [vmem:[#allocation20_spill] sm:$0xff] %v2129_v61  ;;  %3015 = vst [vmem:[#allocation21_spill] sm:$0xff] %v2133_v62 }
  0x25   :  { %121 = vmatprep.subr.mxu0 %v2064_v40  ;;  %192 = vmatprep.subr.mxu1 %v2097_v51  ;;  %3016 = vst [vmem:[#allocation22_spill] sm:$0xff] %v2137_v63 }
  0x26   :  { %122 = vmatpush1.msra.mxu0 %v2070_v42  ;;  %193 = vmatpush1.msra.mxu1 %v2103_v53 }
  0x27   :  { %123 = vmatprep.subr.mxu0 %v2076_v44  ;;  %194 = vmatprep.subr.mxu1 %v2109_v55 }
  0x28   :  { %124 = vmatpush1.msra.mxu0 %v2082_v46  ;;  %195 = vmatpush1.msra.mxu1 %v2115_v57 }
  0x29   :  { %125 = vmatprep.subr.mxu0 %v2088_v48  ;;  %196 = vmatprep.subr.mxu1 %v2121_v59 }
  0x2a   :  { %126 = vmatpush1.msra.mxu0 %v2094_v50  ;;  %197 = vmatpush1.msra.mxu1 %v2125_v60 }
  0x2b   :  { %127 = vmatprep.subr.mxu0 %v2100_v52  ;;  %198 = vmatprep.subr.mxu1 %v2129_v61 }
  0x2c   :  { %128 = vmatpush1.msra.mxu0 %v2106_v54  ;;  %v2140_v54 = vld [vmem:[#allocation2 + $0x10] sm:$0xff]  ;;  %199 = vmatpush1.msra.mxu1 %v2133_v62 }
  0x2d   :  { %129 = vmatprep.subr.mxu0 %v2112_v56  ;;  %3017 = vst [vmem:[#allocation23_spill] sm:$0xff] %v2140_v54  ;;  %200 = vmatprep.subr.mxu1 %v2137_v63 }
  0x2e   :  { %130 = vmatpush1.msra.mxu0 %v2118_v58  ;;  %201 = vmatpush1.msra.mxu1 %v2140_v54 }
  0x2f   :  { %164 = vmatmul.mubr.f32.vlgmr.msra.gmra.mxu0 %v2938_v0  ;;  %274 = vmatprep.subr.mxu0 %v1952_v1 }
  0x30   :  { %275 = vmatpush1.msra.mxu0 %v1954_v2  ;;  %235 = vmatmul.mubr.f32.vlgmr.msra.gmra.mxu1 %v2938_v0  ;;  %v3018_v0 = vld [vmem:[#allocation13_spill] sm:$0xff] }
  0x31   :  { %276 = vmatprep.subr.mxu0 %v1956_v3  ;;  %345 = vmatprep.subr.mxu1 %v1973_v9 }
  0x32   :  { %277 = vmatpush1.msra.mxu0 %v1959_v4  ;;  %346 = vmatpush1.msra.mxu1 %v1979_v11 }
  0x33   :  { %278 = vmatprep.subr.mxu0 %v1962_v5  ;;  %347 = vmatprep.subr.mxu1 %v1985_v13 }
  0x34   :  { %279 = vmatpush1.msra.mxu0 %v1965_v6  ;;  %348 = vmatpush1.msra.mxu1 %v1987_v14 }
  0x35   :  { %280 = vmatprep.subr.mxu0 %v1968_v7  ;;  %349 = vmatprep.subr.mxu1 %v1993_v16 }
  0x36   :  { %281 = vmatpush1.msra.mxu0 %v1971_v8  ;;  %350 = vmatpush1.msra.mxu1 %v1999_v18 }
  0x37   :  { %282 = vmatprep.subr.mxu0 %v1976_v10  ;;  %351 = vmatprep.subr.mxu1 %v2001_v19 }
  0x38   :  { %283 = vmatpush1.msra.mxu0 %v1982_v12  ;;  %352 = vmatpush1.msra.mxu1 %v2007_v21 }
  0x39   :  { %284 = vmatprep.subr.mxu0 %v1990_v15  ;;  %353 = vmatprep.subr.mxu1 %v2013_v23 }
  0x3a   :  { %285 = vmatpush1.msra.mxu0 %v1996_v17  ;;  %354 = vmatpush1.msra.mxu1 %v2019_v25 }
  0x3b   :  { %286 = vmatprep.subr.mxu0 %v2004_v20  ;;  %355 = vmatprep.subr.mxu1 %v2025_v27 }
  0x3c   :  { %287 = vmatpush1.msra.mxu0 %v2010_v22  ;;  %356 = vmatpush1.msra.mxu1 %v2031_v29 }
  0x3d   :  { %288 = vmatprep.subr.mxu0 %v2016_v24  ;;  %357 = vmatprep.subr.mxu1 %v2037_v31 }
  0x3e   :  { %289 = vmatpush1.msra.mxu0 %v2022_v26  ;;  %358 = vmatpush1.msra.mxu1 %v2043_v33 }
  0x3f   :  { %290 = vmatprep.subr.mxu0 %v2028_v28  ;;  %359 = vmatprep.subr.mxu1 %v2049_v35 }
  0x40   :  { %291 = vmatpush1.msra.mxu0 %v2034_v30  ;;  %360 = vmatpush1.msra.mxu1 %v2055_v37 }
  0x41   :  { %292 = vmatprep.subr.mxu0 %v2040_v32  ;;  %361 = vmatprep.subr.mxu1 %v2061_v39 }
  0x42   :  { %293 = vmatpush1.msra.mxu0 %v2046_v34  ;;  %362 = vmatpush1.msra.mxu1 %v2067_v41 }
  0x43   :  { %294 = vmatprep.subr.mxu0 %v2052_v36  ;;  %363 = vmatprep.subr.mxu1 %v2073_v43 }
  0x44   :  { %295 = vmatpush1.msra.mxu0 %v2058_v38  ;;  %364 = vmatpush1.msra.mxu1 %v2079_v45 }
  0x45   :  { %296 = vmatprep.subr.mxu0 %v2064_v40  ;;  %365 = vmatprep.subr.mxu1 %v2085_v47 }
  0x46   :  { %297 = vmatpush1.msra.mxu0 %v2070_v42  ;;  %366 = vmatpush1.msra.mxu1 %v2091_v49 }
  0x47   :  { %298 = vmatprep.subr.mxu0 %v2076_v44  ;;  %367 = vmatprep.subr.mxu1 %v2097_v51 }
  0x48   :  { %299 = vmatpush1.msra.mxu0 %v2082_v46  ;;  %368 = vmatpush1.msra.mxu1 %v2103_v53 }
  0x49   :  { %300 = vmatprep.subr.mxu0 %v2088_v48  ;;  %369 = vmatprep.subr.mxu1 %v2109_v55  ;;  %v3019_v48 = vmov 0.0  }
  0x4a   :  { %301 = vmatpush1.msra.mxu0 %v2094_v50  ;;  %370 = vmatpush1.msra.mxu1 %v2115_v57 }
  0x4b   :  { %302 = vmatprep.subr.mxu0 %v2100_v52  ;;  %371 = vmatprep.subr.mxu1 %v2121_v59 }
  0x4c   :  { %303 = vmatpush1.msra.mxu0 %v3018_v0  ;;  %372 = vmatpush1.msra.mxu1 %v2125_v60  ;;  %v97_v60 = vld [vmem:[%s2931_s0 + $0x10] sm:$0xff] }
  0x4d   :  { %304 = vmatprep.subr.mxu0 %v2112_v56  ;;  %373 = vmatprep.subr.mxu1 %v2129_v61  ;;  %v95_v56 = vld [vmem:[%s2931_s0] sm:$0xff] }
  0x4e   :  { %305 = vmatpush1.msra.mxu0 %v2118_v58  ;;  %374 = vmatpush1.msra.mxu1 %v2133_v62  ;;  %v96_v58 = vld [vmem:[%s2931_s0 + $0x8] sm:$0xff] }
  0x4f   :  { %338 = vmatprep.mubr.f32.mxu0 %v3019_v48  ;;  %375 = vmatprep.subr.mxu1 %v2137_v63 }
  0x50   :  { %409 = vmatprep.mubr.f32.mxu1 %v3019_v48  ;;  %376 = vmatpush1.msra.mxu1 %v2140_v54 }
  0x51   :  { %449 = vmatprep.subr.mxu0 %v1952_v1  ;;  %520 = vmatprep.subr.mxu1 %v1973_v9  ;;  %v98_v9 = vld [vmem:[%s2931_s0 + $0x18] sm:$0xff] }
  0xef   :  { %v165_v0 = vpop.f32.mrf.mxu0 }
  0xf0   :  { %v241_v62 = vadd.f32 %v165_v0, %v95_v56  ;;  %v236_v54 = vpop.f32.mrf.mxu1 }
  0xf1   :  { %v167_v61 = vpop.f32.mrf.mxu0  ;;  %v243_v59 = vadd.f32 %v236_v54, %v97_v60  ;;  %v3022_v54 = vld [vmem:[#allocation14_spill] sm:$0xff] }
  0xf2   :  { %v1593_v63 = vmul.f32 -1.442695, %v241_v62  ;;  %v242_v52 = vadd.f32 %v167_v61, %v96_v58  ;;  %v238_v1 = vpop.f32.mrf.mxu1  ;;  %v3026_v60 = vld [vmem:[#allocation18_spill] sm:$0xff] }
  0xf3   :  { %v244_v50 = vadd.f32 %v238_v1, %v98_v9 }
  0xf4   :  { %1703 = vpow2.f32 %v1593_v63  ;;  %v1594_v48 = vmul.f32 -1.442695, %v242_v52 }
  0xf5   :  { %v1595_v57 = vmul.f32 -1.442695, %v244_v50 }
  0xf6   :  { %1705 = vpow2.f32 %v1594_v48 }
  0xf7   :  { %1707 = vtanh.f32 %v243_v59  ;;  %v3025_v59 = vld [vmem:[#allocation9_spill] sm:$0xff] }
  0xf8   :  { %1709 = vpow2.f32 %v1595_v57  ;;  %v3024_v57 = vld [vmem:[#allocation16_spill] sm:$0xff] }
 0x101   :  { %v1704_v0 = vpop.eup %1703 }
 0x102   :  { %v248_v56 = vadd.f32 1.0, %v1704_v0  ;;  %v3027_v0 = vld [vmem:[#allocation10_spill] sm:$0xff] }
 0x103   :  { %v1706_v58 = vpop.eup %1705 }
 0x104   :  { %1711 = vrcp.f32 %v248_v56  ;;  %v254_v52 = vadd.f32 1.0, %v1706_v58  ;;  %v1708_v48 = vpop.eup %1707  ;;  %v3028_v56 = vld [vmem:[#allocation19_spill] sm:$0xff] }
 0x105   :  { %v1710_v61 = vpop.eup %1709  ;;  %v3029_v58 = vld [vmem:[#allocation11_spill] sm:$0xff] }
 0x106   :  { %1713 = vrcp.f32 %v254_v52  ;;  %v261_v46 = vadd.f32 1.0, %v1710_v61  ;;  %v3030_v52 = vld [vmem:[#allocation20_spill] sm:$0xff]  ;;  %v3032_v61 = vld [vmem:[#allocation21_spill] sm:$0xff] }
 0x108   :  { %1715 = vrcp.f32 %v261_v46  ;;  %v3021_v46 = vld [vmem:[#allocation7_spill] sm:$0xff] }
 0x111   :  { %v1712_v62 = vpop.eup %1711 }
 0x112   :  { %v265_v44 = vmul.f32 %v1712_v62, %v1708_v48  ;;  %v3031_v48 = vld [vmem:[#allocation13_spill] sm:$0xff]  ;;  %v3033_v62 = vld [vmem:[#allocation15_spill] sm:$0xff] }
 0x113   :  { %v1714_v63 = vpop.eup %1713 }
 0x114   :  { %v264_v55 = vmul.f32 0.0, %v1714_v63  ;;  %v3034_v63 = vld [vmem:[#allocation22_spill] sm:$0xff] }
 0x115   :  { %v1716_v1 = vpop.eup %1715 }
 0x116   :  { %v2226_v53 = vadd.f32 %v265_v44, %v264_v55  ;;  %v3020_v44 = vld [vmem:[#allocation12_spill] sm:$0xff] }
 0x117   :  { %v3023_v55 = vld [vmem:[#allocation8_spill] sm:$0xff] }
 0x118   :  { %1717 = vtanh.f32 %v2226_v53 }
 0x125   :  { %v1718_v9 = vpop.eup %1717 }
 0x126   :  { %v268_v50 = vmul.f32 %v1718_v9, %v1716_v1  ;;  %v3035_v1 = vld [vmem:[#allocation17_spill] sm:$0xff]  ;;  %v3036_v9 = vmov 0.0  }
 0x128   :  { %339 = vmatmul.mubr.f32.vlgmr.msra.gmra.mxu0 %v268_v50  ;;  %410 = vmatmul.mubr.f32.vlgmr.msra.gmra.mxu1 %v268_v50  ;;  %v3037_v50 = vld [vmem:[#allocation23_spill] sm:$0xff] }
 0x129   :  { %450 = vmatpush1.msra.mxu0 %v1954_v2  ;;  %521 = vmatpush1.msra.mxu1 %v1979_v11 }
 0x12a   :  { %451 = vmatprep.subr.mxu0 %v1956_v3  ;;  %522 = vmatprep.subr.mxu1 %v1985_v13 }
 0x12b   :  { %452 = vmatpush1.msra.mxu0 %v1959_v4  ;;  %523 = vmatpush1.msra.mxu1 %v1987_v14 }
 0x12c   :  { %453 = vmatprep.subr.mxu0 %v1962_v5  ;;  %524 = vmatprep.subr.mxu1 %v1993_v16 }
 0x12d   :  { %454 = vmatpush1.msra.mxu0 %v1965_v6  ;;  %525 = vmatpush1.msra.mxu1 %v1999_v18 }
 0x12e   :  { %455 = vmatprep.subr.mxu0 %v1968_v7  ;;  %526 = vmatprep.subr.mxu1 %v2001_v19 }
 0x12f   :  { %456 = vmatpush1.msra.mxu0 %v1971_v8  ;;  %527 = vmatpush1.msra.mxu1 %v2007_v21 }
 0x130   :  { %457 = vmatprep.subr.mxu0 %v1976_v10  ;;  %528 = vmatprep.subr.mxu1 %v2013_v23 }
 0x131   :  { %458 = vmatpush1.msra.mxu0 %v1982_v12  ;;  %529 = vmatpush1.msra.mxu1 %v2019_v25 }
 0x132   :  { %459 = vmatprep.subr.mxu0 %v1990_v15  ;;  %530 = vmatprep.subr.mxu1 %v2025_v27 }
 0x133   :  { %460 = vmatpush1.msra.mxu0 %v1996_v17  ;;  %531 = vmatpush1.msra.mxu1 %v2031_v29 }
 0x134   :  { %461 = vmatprep.subr.mxu0 %v2004_v20  ;;  %532 = vmatprep.subr.mxu1 %v2037_v31 }
 0x135   :  { %462 = vmatpush1.msra.mxu0 %v2010_v22  ;;  %533 = vmatpush1.msra.mxu1 %v2043_v33 }
 0x136   :  { %463 = vmatprep.subr.mxu0 %v2016_v24  ;;  %534 = vmatprep.subr.mxu1 %v2049_v35 }
 0x137   :  { %464 = vmatpush1.msra.mxu0 %v2022_v26  ;;  %535 = vmatpush1.msra.mxu1 %v2055_v37 }
 0x138   :  { %465 = vmatprep.subr.mxu0 %v2028_v28  ;;  %536 = vmatprep.subr.mxu1 %v2061_v39 }
 0x139   :  { %466 = vmatpush1.msra.mxu0 %v2034_v30  ;;  %537 = vmatpush1.msra.mxu1 %v2067_v41 }
 0x13a   :  { %467 = vmatprep.subr.mxu0 %v2040_v32  ;;  %538 = vmatprep.subr.mxu1 %v2073_v43 }
 0x13b   :  { %468 = vmatpush1.msra.mxu0 %v2046_v34  ;;  %539 = vmatpush1.msra.mxu1 %v2079_v45 }
 0x13c   :  { %469 = vmatprep.subr.mxu0 %v2052_v36  ;;  %540 = vmatprep.subr.mxu1 %v2085_v47 }
 0x13d   :  { %470 = vmatpush1.msra.mxu0 %v2058_v38  ;;  %541 = vmatpush1.msra.mxu1 %v2091_v49 }
 0x13e   :  { %471 = vmatprep.subr.mxu0 %v2064_v40  ;;  %542 = vmatprep.subr.mxu1 %v2097_v51 }
 0x13f   :  { %472 = vmatpush1.msra.mxu0 %v2070_v42  ;;  %543 = vmatpush1.msra.mxu1 %v3020_v44 }
 0x140   :  { %473 = vmatprep.subr.mxu0 %v3021_v46  ;;  %544 = vmatprep.subr.mxu1 %v3022_v54 }
 0x141   :  { %474 = vmatpush1.msra.mxu0 %v3023_v55  ;;  %545 = vmatpush1.msra.mxu1 %v3024_v57 }
 0x142   :  { %475 = vmatprep.subr.mxu0 %v3025_v59  ;;  %546 = vmatprep.subr.mxu1 %v3026_v60  ;;  %v1598_v59 = vld [vmem:[%s2931_s0 + $0x30] sm:$0xff] }
 0x143   :  { %476 = vmatpush1.msra.mxu0 %v3027_v0  ;;  %547 = vmatpush1.msra.mxu1 %v3028_v56  ;;  %v3038_v56 = vld [vmem:[#allocation5_spill] sm:$0xff] }
 0x144   :  { %477 = vmatprep.subr.mxu0 %v3029_v58  ;;  %548 = vmatprep.subr.mxu1 %v3030_v52  ;;  %v3039_v58 = vld [vmem:[#allocation6_spill] sm:$0xff] }
 0x145   :  { %478 = vmatpush1.msra.mxu0 %v3031_v48  ;;  %549 = vmatpush1.msra.mxu1 %v3032_v61  ;;  %v1596_v61 = vld [vmem:[%s2931_s0 + $0x20] sm:$0xff] }
 0x146   :  { %479 = vmatprep.subr.mxu0 %v3033_v62  ;;  %550 = vmatprep.subr.mxu1 %v3034_v63  ;;  %v1597_v63 = vld [vmem:[%s2931_s0 + $0x28] sm:$0xff] }
 0x147   :  { %480 = vmatpush1.msra.mxu0 %v3035_v1  ;;  %513 = vmatprep.mubr.f32.mxu0 %v3036_v9 }
 0x148   :  { %551 = vmatpush1.msra.mxu1 %v3037_v50  ;;  %584 = vmatprep.mubr.f32.mxu1 %v3036_v9 }
 0x149   :  { %624 = vmatprep.subr.mxu0 %v3038_v56  ;;  %695 = vmatprep.subr.mxu1 %v3039_v58  ;;  %v1599_v58 = vld [vmem:[%s2931_s0 + $0x38] sm:$0xff] }
 0x1e8   :  { %v340_v48 = vpop.f32.mrf.mxu0  ;;  %v411_v50 = vpop.f32.mrf.mxu1 }
 0x1e9   :  { %v416_v1 = vadd.f32 %v1596_v61, %v340_v48  ;;  %v418_v48 = vadd.f32 %v1598_v59, %v411_v50  ;;  %v3043_v50 = vld [vmem:[#allocation16_spill] sm:$0xff] }
 0x1ea   :  { %v342_v62 = vpop.f32.mrf.mxu0  ;;  %v413_v56 = vpop.f32.mrf.mxu1 }
 0x1eb   :  { %v1600_v52 = vmul.f32 -1.442695, %v416_v1  ;;  %v417_v0 = vadd.f32 %v1597_v63, %v342_v62  ;;  %v419_v60 = vadd.f32 %v1599_v58, %v413_v56 }
 0x1ed   :  { %1719 = vpow2.f32 %v1600_v52  ;;  %v1601_v9 = vmul.f32 -1.442695, %v417_v0  ;;  %v1602_v57 = vmul.f32 -1.442695, %v419_v60  ;;  %v3042_v60 = vld [vmem:[#allocation8_spill] sm:$0xff] }
 0x1ef   :  { %1721 = vpow2.f32 %v1601_v9 }
 0x1f0   :  { %1723 = vpow2.f32 %v1602_v57 }
 0x1fa   :  { %v1720_v55 = vpop.eup %1719 }
 0x1fb   :  { %v423_v61 = vadd.f32 1.0, %v1720_v55 }
 0x1fc   :  { %v1722_v1 = vpop.eup %1721 }
 0x1fd   :  { %1725 = vrcp.f32 %v423_v61  ;;  %v429_v52 = vadd.f32 1.0, %v1722_v1  ;;  %v1724_v0 = vpop.eup %1723  ;;  %v3045_v61 = vld [vmem:[#allocation18_spill] sm:$0xff] }
 0x1fe   :  { %1727 = vtanh.f32 %v418_v48  ;;  %v436_v54 = vadd.f32 1.0, %v1724_v0  ;;  %v3044_v48 = vld [vmem:[#allocation9_spill] sm:$0xff]  ;;  %v3046_v1 = vld [vmem:[#allocation10_spill] sm:$0xff]  ;;  %v3048_v0 = vld [vmem:[#allocation11_spill] sm:$0xff] }
 0x1ff   :  { %1729 = vrcp.f32 %v429_v52  ;;  %v3047_v52 = vld [vmem:[#allocation19_spill] sm:$0xff] }
 0x200   :  { %1731 = vrcp.f32 %v436_v54  ;;  %v3041_v54 = vld [vmem:[#allocation14_spill] sm:$0xff] }
 0x20a   :  { %v1726_v62 = vpop.eup %1725 }
 0x20b   :  { %v1728_v63 = vpop.eup %1727 }
 0x20c   :  { %v1730_v9 = vpop.eup %1729  ;;  %v440_v56 = vmul.f32 %v1728_v63, %v1726_v62  ;;  %v3049_v62 = vld [vmem:[#allocation20_spill] sm:$0xff]  ;;  %v3050_v63 = vld [vmem:[#allocation13_spill] sm:$0xff] }
 0x20d   :  { %v439_v58 = vmul.f32 %v1730_v9, %v2226_v53  ;;  %v1732_v55 = vpop.eup %1731  ;;  %v3040_v53 = vld [vmem:[#allocation7_spill] sm:$0xff]  ;;  %v3051_v9 = vld [vmem:[#allocation21_spill] sm:$0xff] }
 0x20f   :  { %v2308_v46 = vadd.f32 %v440_v56, %v439_v58  ;;  %v3052_v56 = vld [vmem:[#allocation15_spill] sm:$0xff]  ;;  %v3053_v58 = vld [vmem:[#allocation22_spill] sm:$0xff] }
 0x211   :  { %1733 = vtanh.f32 %v2308_v46 }
 0x21e   :  { %v1734_v59 = vpop.eup %1733 }
 0x21f   :  { %v443_v57 = vmul.f32 %v1734_v59, %v1732_v55  ;;  %v3054_v55 = vld [vmem:[#allocation17_spill] sm:$0xff]  ;;  %v3055_v59 = vmov 0.0  }
 0x221   :  { %514 = vmatmul.mubr.f32.vlgmr.msra.gmra.mxu0 %v443_v57  ;;  %585 = vmatmul.mubr.f32.vlgmr.msra.gmra.mxu1 %v443_v57  ;;  %v3056_v57 = vld [vmem:[#allocation23_spill] sm:$0xff] }
 0x222   :  { %625 = vmatpush1.msra.mxu0 %v1954_v2  ;;  %696 = vmatpush1.msra.mxu1 %v1979_v11 }
 0x223   :  { %626 = vmatprep.subr.mxu0 %v1956_v3  ;;  %697 = vmatprep.subr.mxu1 %v1985_v13 }
 0x224   :  { %627 = vmatpush1.msra.mxu0 %v1959_v4  ;;  %698 = vmatpush1.msra.mxu1 %v1987_v14 }
 0x225   :  { %628 = vmatprep.subr.mxu0 %v1962_v5  ;;  %699 = vmatprep.subr.mxu1 %v1993_v16 }
 0x226   :  { %629 = vmatpush1.msra.mxu0 %v1965_v6  ;;  %700 = vmatpush1.msra.mxu1 %v1999_v18 }
 0x227   :  { %630 = vmatprep.subr.mxu0 %v1968_v7  ;;  %701 = vmatprep.subr.mxu1 %v2001_v19 }
 0x228   :  { %631 = vmatpush1.msra.mxu0 %v1971_v8  ;;  %702 = vmatpush1.msra.mxu1 %v2007_v21 }
 0x229   :  { %632 = vmatprep.subr.mxu0 %v1976_v10  ;;  %703 = vmatprep.subr.mxu1 %v2013_v23 }
 0x22a   :  { %633 = vmatpush1.msra.mxu0 %v1982_v12  ;;  %704 = vmatpush1.msra.mxu1 %v2019_v25 }
 0x22b   :  { %634 = vmatprep.subr.mxu0 %v1990_v15  ;;  %705 = vmatprep.subr.mxu1 %v2025_v27 }
 0x22c   :  { %635 = vmatpush1.msra.mxu0 %v1996_v17  ;;  %706 = vmatpush1.msra.mxu1 %v2031_v29 }
 0x22d   :  { %636 = vmatprep.subr.mxu0 %v2004_v20  ;;  %707 = vmatprep.subr.mxu1 %v2037_v31 }
 0x22e   :  { %637 = vmatpush1.msra.mxu0 %v2010_v22  ;;  %708 = vmatpush1.msra.mxu1 %v2043_v33 }
 0x22f   :  { %638 = vmatprep.subr.mxu0 %v2016_v24  ;;  %709 = vmatprep.subr.mxu1 %v2049_v35 }
 0x230   :  { %639 = vmatpush1.msra.mxu0 %v2022_v26  ;;  %710 = vmatpush1.msra.mxu1 %v2055_v37 }
 0x231   :  { %640 = vmatprep.subr.mxu0 %v2028_v28  ;;  %711 = vmatprep.subr.mxu1 %v2061_v39 }
 0x232   :  { %641 = vmatpush1.msra.mxu0 %v2034_v30  ;;  %712 = vmatpush1.msra.mxu1 %v2067_v41 }
 0x233   :  { %642 = vmatprep.subr.mxu0 %v2040_v32  ;;  %713 = vmatprep.subr.mxu1 %v2073_v43 }
 0x234   :  { %643 = vmatpush1.msra.mxu0 %v2046_v34  ;;  %714 = vmatpush1.msra.mxu1 %v2079_v45 }
 0x235   :  { %644 = vmatprep.subr.mxu0 %v2052_v36  ;;  %715 = vmatprep.subr.mxu1 %v2085_v47 }
 0x236   :  { %645 = vmatpush1.msra.mxu0 %v2058_v38  ;;  %716 = vmatpush1.msra.mxu1 %v2091_v49 }
 0x237   :  { %646 = vmatprep.subr.mxu0 %v2064_v40  ;;  %717 = vmatprep.subr.mxu1 %v2097_v51 }
 0x238   :  { %647 = vmatpush1.msra.mxu0 %v2070_v42  ;;  %718 = vmatpush1.msra.mxu1 %v3020_v44 }
 0x239   :  { %648 = vmatprep.subr.mxu0 %v3040_v53  ;;  %719 = vmatprep.subr.mxu1 %v3041_v54 }
 0x23a   :  { %649 = vmatpush1.msra.mxu0 %v3042_v60  ;;  %720 = vmatpush1.msra.mxu1 %v3043_v50 }
 0x23b   :  { %650 = vmatprep.subr.mxu0 %v3044_v48  ;;  %721 = vmatprep.subr.mxu1 %v3045_v61  ;;  %v1605_v48 = vld [vmem:[%s2931_s0 + $0x50] sm:$0xff] }
 0x23c   :  { %651 = vmatpush1.msra.mxu0 %v3046_v1  ;;  %722 = vmatpush1.msra.mxu1 %v3047_v52  ;;  %v3057_v52 = vld [vmem:[#allocation5_spill] sm:$0xff] }
 0x23d   :  { %652 = vmatprep.subr.mxu0 %v3048_v0  ;;  %723 = vmatprep.subr.mxu1 %v3049_v62  ;;  %v3058_v0 = vld [vmem:[#allocation6_spill] sm:$0xff] }
 0x23e   :  { %653 = vmatpush1.msra.mxu0 %v3050_v63  ;;  %724 = vmatpush1.msra.mxu1 %v3051_v9  ;;  %v1603_v9 = vld [vmem:[%s2931_s0 + $0x40] sm:$0xff] }
 0x23f   :  { %654 = vmatprep.subr.mxu0 %v3052_v56  ;;  %725 = vmatprep.subr.mxu1 %v3053_v58  ;;  %v1604_v58 = vld [vmem:[%s2931_s0 + $0x48] sm:$0xff] }
 0x240   :  { %655 = vmatpush1.msra.mxu0 %v3054_v55  ;;  %688 = vmatprep.mubr.f32.mxu0 %v3055_v59 }
 0x241   :  { %726 = vmatpush1.msra.mxu1 %v3056_v57  ;;  %759 = vmatprep.mubr.f32.mxu1 %v3055_v59 }
 0x242   :  { %799 = vmatprep.subr.mxu0 %v3057_v52  ;;  %870 = vmatprep.subr.mxu1 %v3058_v0  ;;  %v1606_v52 = vld [vmem:[%s2931_s0 + $0x58] sm:$0xff] }
 0x2e1   :  { %v515_v63 = vpop.f32.mrf.mxu0  ;;  %v586_v57 = vpop.f32.mrf.mxu1 }
 0x2e2   :  { %v591_v55 = vadd.f32 %v1603_v9, %v515_v63  ;;  %v593_v63 = vadd.f32 %v1605_v48, %v586_v57 }
 0x2e3   :  { %v517_v56 = vpop.f32.mrf.mxu0  ;;  %v588_v0 = vpop.f32.mrf.mxu1 }
 0x2e4   :  { %v1607_v62 = vmul.f32 -1.442695, %v591_v55  ;;  %v592_v1 = vadd.f32 %v1604_v58, %v517_v56  ;;  %v594_v61 = vadd.f32 %v1606_v52, %v588_v0 }
 0x2e6   :  { %1735 = vpow2.f32 %v1607_v62  ;;  %v1608_v59 = vmul.f32 -1.442695, %v592_v1  ;;  %v1609_v50 = vmul.f32 -1.442695, %v594_v61 }
 0x2e8   :  { %1737 = vpow2.f32 %v1608_v59 }
 0x2e9   :  { %1739 = vpow2.f32 %v1609_v50 }
 0x2f3   :  { %v1736_v60 = vpop.eup %1735 }
 0x2f4   :  { %v598_v9 = vadd.f32 1.0, %v1736_v60 }
 0x2f5   :  { %v1738_v55 = vpop.eup %1737 }
 0x2f6   :  { %1741 = vrcp.f32 %v598_v9  ;;  %v604_v62 = vadd.f32 1.0, %v1738_v55  ;;  %v1740_v1 = vpop.eup %1739 }
 0x2f7   :  { %1743 = vtanh.f32 %v593_v63  ;;  %v611_v54 = vadd.f32 1.0, %v1740_v1  ;;  %v2477_v1 = vld [vmem:[#allocation2 + $0x1e0] sm:$0xff] }
 0x2f8   :  { %1745 = vrcp.f32 %v604_v62 }
 0x2f9   :  { %1747 = vrcp.f32 %v611_v54 }
 0x303   :  { %v1742_v56 = vpop.eup %1741 }
 0x304   :  { %v1744_v58 = vpop.eup %1743 }
 0x305   :  { %v1746_v59 = vpop.eup %1745  ;;  %v615_v0 = vmul.f32 %v1744_v58, %v1742_v56  ;;  %v2480_v56 = vld [vmem:[#allocation2 + $0x1f0] sm:$0xff]  ;;  %v2483_v58 = vld [vmem:[#allocation2 + $0x1c8] sm:$0xff] }
 0x306   :  { %v614_v52 = vmul.f32 %v1746_v59, %v2308_v46  ;;  %v1748_v60 = vpop.eup %1747  ;;  %v2489_v59 = vld [vmem:[#allocation2 + $0x1c0] sm:$0xff] }
 0x308   :  { %v2390_v53 = vadd.f32 %v615_v0, %v614_v52  ;;  %v2492_v0 = vld [vmem:[#allocation2 + $0x1d0] sm:$0xff]  ;;  %v2495_v52 = vld [vmem:[#allocation2 + $0x1a8] sm:$0xff] }
 0x30a   :  { %1749 = vtanh.f32 %v2390_v53 }
 0x317   :  { %v1750_v48 = vpop.eup %1749 }
 0x318   :  { %v618_v50 = vmul.f32 %v1750_v48, %v1748_v60  ;;  %v2498_v60 = vld [vmem:[#allocation2 + $0x1b8] sm:$0xff]  ;;  %v2501_v48 = vld [vmem:[#allocation2 + $0x1a0] sm:$0xff] }
 0x31a   :  { %689 = vmatmul.mubr.f32.vlgmr.msra.gmra.mxu0 %v618_v50  ;;  %760 = vmatmul.mubr.f32.vlgmr.msra.gmra.mxu1 %v618_v50  ;;  %v2504_v50 = vld [vmem:[#allocation2 + $0x1b0] sm:$0xff] }
 0x31b   :  { %800 = vmatpush1.msra.mxu0 %v1954_v2  ;;  %871 = vmatpush1.msra.mxu1 %v1979_v11  ;;  %v3059_v2 = vld [vmem:[#allocation7_spill] sm:$0xff] }
 0x31c   :  { %801 = vmatprep.subr.mxu0 %v1956_v3  ;;  %872 = vmatprep.subr.mxu1 %v1985_v13  ;;  %v3060_v3 = vld [vmem:[#allocation14_spill] sm:$0xff]  ;;  %v3067_v11 = vld [vmem:[#allocation11_spill] sm:$0xff]  ;;  %v3069_v13 = vld [vmem:[#allocation13_spill] sm:$0xff] }
 0x31d   :  { %802 = vmatpush1.msra.mxu0 %v1959_v4  ;;  %873 = vmatpush1.msra.mxu1 %v1987_v14  ;;  %v3061_v4 = vld [vmem:[#allocation8_spill] sm:$0xff]  ;;  %v3070_v14 = vld [vmem:[#allocation21_spill] sm:$0xff] }
 0x31e   :  { %803 = vmatprep.subr.mxu0 %v1962_v5  ;;  %874 = vmatprep.subr.mxu1 %v1993_v16  ;;  %v3062_v5 = vld [vmem:[#allocation16_spill] sm:$0xff]  ;;  %v3072_v16 = vld [vmem:[#allocation22_spill] sm:$0xff] }
 0x31f   :  { %804 = vmatpush1.msra.mxu0 %v1965_v6  ;;  %875 = vmatpush1.msra.mxu1 %v1999_v18  ;;  %v3063_v6 = vld [vmem:[#allocation9_spill] sm:$0xff]  ;;  %v3074_v18 = vmov 0.0  }
 0x320   :  { %805 = vmatprep.subr.mxu0 %v1968_v7  ;;  %876 = vmatprep.subr.mxu1 %v2001_v19  ;;  %v3064_v7 = vld [vmem:[#allocation18_spill] sm:$0xff]  ;;  %v3075_v19 = vld [vmem:[#allocation23_spill] sm:$0xff] }
 0x321   :  { %806 = vmatpush1.msra.mxu0 %v1971_v8  ;;  %877 = vmatpush1.msra.mxu1 %v2007_v21  ;;  %v3065_v8 = vld [vmem:[#allocation10_spill] sm:$0xff] }
 0x322   :  { %807 = vmatprep.subr.mxu0 %v1976_v10  ;;  %878 = vmatprep.subr.mxu1 %v2013_v23  ;;  %v3066_v10 = vld [vmem:[#allocation19_spill] sm:$0xff]  ;;  %v3077_v21 = vld [vmem:[#allocation6_spill] sm:$0xff] }
 0x323   :  { %808 = vmatpush1.msra.mxu0 %v1982_v12  ;;  %879 = vmatpush1.msra.mxu1 %v2019_v25  ;;  %v3068_v12 = vld [vmem:[#allocation20_spill] sm:$0xff] }
 0x324   :  { %809 = vmatprep.subr.mxu0 %v1990_v15  ;;  %880 = vmatprep.subr.mxu1 %v2025_v27  ;;  %v3071_v15 = vld [vmem:[#allocation15_spill] sm:$0xff] }
 0x325   :  { %810 = vmatpush1.msra.mxu0 %v1996_v17  ;;  %881 = vmatpush1.msra.mxu1 %v2031_v29  ;;  %v3073_v17 = vld [vmem:[#allocation17_spill] sm:$0xff] }
 0x326   :  { %811 = vmatprep.subr.mxu0 %v2004_v20  ;;  %882 = vmatprep.subr.mxu1 %v2037_v31  ;;  %v2457_v20 = vld [vmem:[#allocation2 + $0x1e8] sm:$0xff]  ;;  %v1613_v31 = vld [vmem:[%s2931_s0 + $0x78] sm:$0xff] }
 0x327   :  { %812 = vmatpush1.msra.mxu0 %v2010_v22  ;;  %883 = vmatpush1.msra.mxu1 %v2043_v33  ;;  %3076 = vst [vmem:[#allocation12_spill] sm:$0xff] %v2457_v20  ;;  %v1610_v22 = vld [vmem:[%s2931_s0 + $0x60] sm:$0xff] }
 0x328   :  { %813 = vmatprep.subr.mxu0 %v2016_v24  ;;  %884 = vmatprep.subr.mxu1 %v2049_v35  ;;  %v1611_v24 = vld [vmem:[%s2931_s0 + $0x68] sm:$0xff] }
 0x329   :  { %814 = vmatpush1.msra.mxu0 %v2022_v26  ;;  %885 = vmatpush1.msra.mxu1 %v2055_v37 }
 0x32a   :  { %815 = vmatprep.subr.mxu0 %v2028_v28  ;;  %886 = vmatprep.subr.mxu1 %v2061_v39 }
 0x32b   :  { %816 = vmatpush1.msra.mxu0 %v2034_v30  ;;  %887 = vmatpush1.msra.mxu1 %v2067_v41 }
 0x32c   :  { %817 = vmatprep.subr.mxu0 %v2040_v32  ;;  %888 = vmatprep.subr.mxu1 %v2073_v43 }
 0x32d   :  { %818 = vmatpush1.msra.mxu0 %v2046_v34  ;;  %889 = vmatpush1.msra.mxu1 %v2079_v45  ;;  %v1612_v34 = vld [vmem:[%s2931_s0 + $0x70] sm:$0xff] }
 0x32e   :  { %819 = vmatprep.subr.mxu0 %v2052_v36  ;;  %890 = vmatprep.subr.mxu1 %v2085_v47 }
 0x32f   :  { %820 = vmatpush1.msra.mxu0 %v2058_v38  ;;  %891 = vmatpush1.msra.mxu1 %v2091_v49 }
 0x330   :  { %821 = vmatprep.subr.mxu0 %v2064_v40  ;;  %892 = vmatprep.subr.mxu1 %v2097_v51 }
 0x331   :  { %822 = vmatpush1.msra.mxu0 %v2070_v42  ;;  %893 = vmatpush1.msra.mxu1 %v3020_v44 }
 0x332   :  { %823 = vmatprep.subr.mxu0 %v3059_v2  ;;  %894 = vmatprep.subr.mxu1 %v3060_v3  ;;  %v2507_v2 = vld [vmem:[#allocation2 + $0x188] sm:$0xff] }
 0x333   :  { %824 = vmatpush1.msra.mxu0 %v3061_v4  ;;  %895 = vmatpush1.msra.mxu1 %v3062_v5  ;;  %v2510_v4 = vld [vmem:[#allocation2 + $0x198] sm:$0xff] }
 0x334   :  { %825 = vmatprep.subr.mxu0 %v3063_v6  ;;  %896 = vmatprep.subr.mxu1 %v3064_v7  ;;  %v2513_v6 = vld [vmem:[#allocation2 + $0x180] sm:$0xff] }
 0x335   :  { %826 = vmatpush1.msra.mxu0 %v3065_v8  ;;  %897 = vmatpush1.msra.mxu1 %v3066_v10  ;;  %v2516_v8 = vld [vmem:[#allocation2 + $0x190] sm:$0xff] }
 0x336   :  { %827 = vmatprep.subr.mxu0 %v3067_v11  ;;  %898 = vmatprep.subr.mxu1 %v3068_v12  ;;  %v2519_v11 = vld [vmem:[#allocation2 + $0x168] sm:$0xff] }
 0x337   :  { %828 = vmatpush1.msra.mxu0 %v3069_v13  ;;  %899 = vmatpush1.msra.mxu1 %v3070_v14 }
 0x338   :  { %829 = vmatprep.subr.mxu0 %v3071_v15  ;;  %900 = vmatprep.subr.mxu1 %v3072_v16 }
 0x339   :  { %830 = vmatpush1.msra.mxu0 %v3073_v17  ;;  %863 = vmatprep.mubr.f32.mxu0 %v3074_v18 }
 0x33a   :  { %901 = vmatpush1.msra.mxu1 %v3075_v19  ;;  %934 = vmatprep.mubr.f32.mxu1 %v3074_v18 }
 0x33b   :  { %974 = vmatprep.subr.mxu0 %v2457_v20  ;;  %1045 = vmatprep.subr.mxu1 %v3077_v21  ;;  %v2522_v21 = vld [vmem:[#allocation2 + $0x178] sm:$0xff] }
 0x3da   :  { %v690_v23 = vpop.f32.mrf.mxu0  ;;  %v761_v29 = vpop.f32.mrf.mxu1 }
 0x3db   :  { %v766_v25 = vadd.f32 %v1610_v22, %v690_v23  ;;  %v768_v37 = vadd.f32 %v1612_v34, %v761_v29  ;;  %v2525_v22 = vld [vmem:[#allocation2 + $0x160] sm:$0xff]  ;;  %v2528_v23 = vld [vmem:[#allocation2 + $0x170] sm:$0xff]  ;;  %v2546_v29 = vld [vmem:[#allocation2 + $0x138] sm:$0xff] }
 0x3dc   :  { %v692_v26 = vpop.f32.mrf.mxu0  ;;  %v763_v32 = vpop.f32.mrf.mxu1  ;;  %v2561_v34 = vld [vmem:[#allocation2 + $0x100] sm:$0xff] }
 0x3dd   :  { %v1614_v27 = vmul.f32 -1.442695, %v766_v25  ;;  %v767_v28 = vadd.f32 %v1611_v24, %v692_v26  ;;  %v769_v33 = vadd.f32 %v1613_v31, %v763_v32  ;;  %v2531_v24 = vld [vmem:[#allocation2 + $0x148] sm:$0xff]  ;;  %v2534_v25 = vld [vmem:[#allocation2 + $0x158] sm:$0xff]  ;;  %v2537_v26 = vld [vmem:[#allocation2 + $0x140] sm:$0xff] }
 0x3de   :  { %v2552_v31 = vld [vmem:[#allocation2 + $0x130] sm:$0xff]  ;;  %v2555_v32 = vld [vmem:[#allocation2 + $0x108] sm:$0xff] }
 0x3df   :  { %1751 = vpow2.f32 %v1614_v27  ;;  %v1615_v30 = vmul.f32 -1.442695, %v767_v28  ;;  %v1616_v35 = vmul.f32 -1.442695, %v769_v33  ;;  %v2540_v27 = vld [vmem:[#allocation2 + $0x150] sm:$0xff]  ;;  %v2543_v28 = vld [vmem:[#allocation2 + $0x128] sm:$0xff] }
 0x3e0   :  { %v2558_v33 = vld [vmem:[#allocation2 + $0x118] sm:$0xff] }
 0x3e1   :  { %1753 = vpow2.f32 %v1615_v30  ;;  %v2549_v30 = vld [vmem:[#allocation2 + $0x120] sm:$0xff] }
 0x3e2   :  { %1755 = vpow2.f32 %v1616_v35  ;;  %v2564_v35 = vld [vmem:[#allocation2 + $0x110] sm:$0xff] }
 0x3ec   :  { %v1752_v36 = vpop.eup %1751 }
 0x3ed   :  { %v773_v38 = vadd.f32 1.0, %v1752_v36  ;;  %v2567_v36 = vld [vmem:[#allocation2 + $0xe8] sm:$0xff] }
 0x3ee   :  { %v1754_v39 = vpop.eup %1753 }
 0x3ef   :  { %1757 = vrcp.f32 %v773_v38  ;;  %v779_v40 = vadd.f32 1.0, %v1754_v39  ;;  %v1756_v41 = vpop.eup %1755  ;;  %v2573_v38 = vld [vmem:[#allocation2 + $0xe0] sm:$0xff]  ;;  %v2576_v39 = vld [vmem:[#allocation2 + $0xf0] sm:$0xff] }
 0x3f0   :  { %1759 = vtanh.f32 %v768_v37  ;;  %v786_v54 = vadd.f32 1.0, %v1756_v41  ;;  %v2570_v37 = vld [vmem:[#allocation2 + $0xf8] sm:$0xff] }
 0x3f1   :  { %1761 = vrcp.f32 %v779_v40  ;;  %v2579_v40 = vld [vmem:[#allocation2 + $0xc8] sm:$0xff]  ;;  %v2582_v41 = vld [vmem:[#allocation2 + $0xd8] sm:$0xff] }
 0x3f2   :  { %1763 = vrcp.f32 %v786_v54  ;;  %v2597_v54 = vld [vmem:[#allocation2 + $0x88] sm:$0xff] }
 0x3fc   :  { %v1758_v42 = vpop.eup %1757 }
 0x3fd   :  { %v1760_v43 = vpop.eup %1759 }
 0x3fe   :  { %v1762_v46 = vpop.eup %1761  ;;  %v790_v61 = vmul.f32 %v1760_v43, %v1758_v42  ;;  %v2585_v42 = vld [vmem:[#allocation2 + $0xc0] sm:$0xff]  ;;  %v2589_v43 = vld [vmem:[#allocation2 + $0xa8] sm:$0xff] }
 0x3ff   :  { %v789_v57 = vmul.f32 %v1762_v46, %v2390_v53  ;;  %v1764_v9 = vpop.eup %1763  ;;  %v2486_v53 = vld [vmem:[#allocation2 + $0x1d8] sm:$0xff]  ;;  %v2593_v46 = vld [vmem:[#allocation2 + $0xa0] sm:$0xff] }
 0x401   :  { %v2474_v63 = vadd.f32 %v790_v61, %v789_v57  ;;  %v2601_v61 = vld [vmem:[#allocation2 + $0x80] sm:$0xff] }
 0x403   :  { %1765 = vtanh.f32 %v2474_v63 }
 0x410   :  { %v1766_v55 = vpop.eup %1765 }
 0x411   :  { %v793_v62 = vmul.f32 %v1766_v55, %v1764_v9  ;;  %v1619_v55 = vld [vmem:[%s2931_s0 + $0x90] sm:$0xff] }
 0x413   :  { %864 = vmatmul.mubr.f32.vlgmr.msra.gmra.mxu0 %v793_v62  ;;  %935 = vmatmul.mubr.f32.vlgmr.msra.gmra.mxu1 %v793_v62 }
 0x414   :  { %975 = vmatpush1.msra.mxu0 %v2477_v1  ;;  %1046 = vmatpush1.msra.mxu1 %v2480_v56 }
 0x415   :  { %976 = vmatprep.subr.mxu0 %v2483_v58  ;;  %1047 = vmatprep.subr.mxu1 %v2486_v53 }
 0x416   :  { %977 = vmatpush1.msra.mxu0 %v2489_v59  ;;  %1048 = vmatpush1.msra.mxu1 %v2492_v0 }
 0x417   :  { %978 = vmatprep.subr.mxu0 %v2495_v52  ;;  %1049 = vmatprep.subr.mxu1 %v2498_v60 }
 0x418   :  { %979 = vmatpush1.msra.mxu0 %v2501_v48  ;;  %1050 = vmatpush1.msra.mxu1 %v2504_v50 }
 0x419   :  { %980 = vmatprep.subr.mxu0 %v2507_v2  ;;  %1051 = vmatprep.subr.mxu1 %v2510_v4 }
 0x41a   :  { %981 = vmatpush1.msra.mxu0 %v2513_v6  ;;  %1052 = vmatpush1.msra.mxu1 %v2516_v8 }
 0x41b   :  { %982 = vmatprep.subr.mxu0 %v2519_v11  ;;  %1053 = vmatprep.subr.mxu1 %v2522_v21 }
 0x41c   :  { %983 = vmatpush1.msra.mxu0 %v2525_v22  ;;  %1054 = vmatpush1.msra.mxu1 %v2528_v23 }
 0x41d   :  { %984 = vmatprep.subr.mxu0 %v2531_v24  ;;  %1055 = vmatprep.subr.mxu1 %v2534_v25 }
 0x41e   :  { %985 = vmatpush1.msra.mxu0 %v2537_v26  ;;  %1056 = vmatpush1.msra.mxu1 %v2540_v27 }
 0x41f   :  { %986 = vmatprep.subr.mxu0 %v2543_v28  ;;  %1057 = vmatprep.subr.mxu1 %v2546_v29 }
 0x420   :  { %987 = vmatpush1.msra.mxu0 %v2549_v30  ;;  %1058 = vmatpush1.msra.mxu1 %v2552_v31 }
 0x421   :  { %988 = vmatprep.subr.mxu0 %v2555_v32  ;;  %1059 = vmatprep.subr.mxu1 %v2558_v33 }
 0x422   :  { %989 = vmatpush1.msra.mxu0 %v2561_v34  ;;  %1060 = vmatpush1.msra.mxu1 %v2564_v35 }
 0x423   :  { %990 = vmatprep.subr.mxu0 %v2567_v36  ;;  %1061 = vmatprep.subr.mxu1 %v2570_v37 }
 0x424   :  { %991 = vmatpush1.msra.mxu0 %v2573_v38  ;;  %1062 = vmatpush1.msra.mxu1 %v2576_v39 }
 0x425   :  { %992 = vmatprep.subr.mxu0 %v2579_v40  ;;  %1063 = vmatprep.subr.mxu1 %v2582_v41 }
 0x426   :  { %993 = vmatpush1.msra.mxu0 %v2585_v42  ;;  %1064 = vmatpush1.msra.mxu1 %v2079_v45  ;;  %v2605_v45 = vld [vmem:[#allocation2 + $0x68] sm:$0xff] }
 0x427   :  { %994 = vmatprep.subr.mxu0 %v2589_v43  ;;  %1065 = vmatprep.subr.mxu1 %v2085_v47  ;;  %3078 = vst [vmem:[#allocation5_spill] sm:$0xff] %v2605_v45  ;;  %v2609_v47 = vld [vmem:[#allocation2 + $0x60] sm:$0xff] }
 0x428   :  { %995 = vmatpush1.msra.mxu0 %v2593_v46  ;;  %1066 = vmatpush1.msra.mxu1 %v2091_v49  ;;  %3079 = vst [vmem:[#allocation7_spill] sm:$0xff] %v2609_v47  ;;  %v2613_v49 = vld [vmem:[#allocation2 + $0x48] sm:$0xff] }
 0x429   :  { %996 = vmatprep.subr.mxu0 %v2597_v54  ;;  %1067 = vmatprep.subr.mxu1 %v2097_v51  ;;  %3080 = vst [vmem:[#allocation14_spill] sm:$0xff] %v2613_v49  ;;  %v2617_v51 = vld [vmem:[#allocation2 + $0x40] sm:$0xff] }
 0x42a   :  { %997 = vmatpush1.msra.mxu0 %v2601_v61  ;;  %1068 = vmatpush1.msra.mxu1 %v3020_v44  ;;  %3081 = vst [vmem:[#allocation8_spill] sm:$0xff] %v2617_v51  ;;  %v2621_v44 = vld [vmem:[#allocation2 + $0x28] sm:$0xff] }
 0x42b   :  { %998 = vmatprep.subr.mxu0 %v2605_v45  ;;  %1069 = vmatprep.subr.mxu1 %v3060_v3  ;;  %3082 = vst [vmem:[#allocation16_spill] sm:$0xff] %v2621_v44  ;;  %v2634_v3 = vld [vmem:[#allocation2 + $0x1f8] sm:$0xff] }
 0x42c   :  { %999 = vmatpush1.msra.mxu0 %v2609_v47  ;;  %1070 = vmatpush1.msra.mxu1 %v3062_v5  ;;  %3083 = vst [vmem:[#allocation9_spill] sm:$0xff] %v2634_v3  ;;  %v1617_v5 = vld [vmem:[%s2931_s0 + $0x80] sm:$0xff] }
 0x42d   :  { %1000 = vmatprep.subr.mxu0 %v2613_v49  ;;  %1071 = vmatprep.subr.mxu1 %v3064_v7 }
 0x42e   :  { %1001 = vmatpush1.msra.mxu0 %v2617_v51  ;;  %1072 = vmatpush1.msra.mxu1 %v3066_v10  ;;  %v1618_v10 = vld [vmem:[%s2931_s0 + $0x88] sm:$0xff] }
 0x42f   :  { %1002 = vmatprep.subr.mxu0 %v2621_v44  ;;  %1073 = vmatprep.subr.mxu1 %v3068_v12 }
 0x430   :  { %1003 = vmatpush1.msra.mxu0 %v3069_v13  ;;  %1074 = vmatpush1.msra.mxu1 %v3070_v14 }
 0x431   :  { %1004 = vmatprep.subr.mxu0 %v3071_v15  ;;  %1075 = vmatprep.subr.mxu1 %v3072_v16 }
 0x432   :  { %1005 = vmatpush1.msra.mxu0 %v3073_v17  ;;  %1038 = vmatprep.mubr.f32.mxu0 %v3074_v18 }
 0x433   :  { %1076 = vmatpush1.msra.mxu1 %v3075_v19  ;;  %1109 = vmatprep.mubr.f32.mxu1 %v3074_v18  ;;  %v1620_v19 = vld [vmem:[%s2931_s0 + $0x98] sm:$0xff] }
 0x434   :  { %1149 = vmatprep.subr.mxu0 %v2457_v20  ;;  %1220 = vmatprep.subr.mxu1 %v2634_v3 }
 0x4d3   :  { %v865_v7 = vpop.f32.mrf.mxu0  ;;  %v936_v16 = vpop.f32.mrf.mxu1 }
 0x4d4   :  { %v941_v12 = vadd.f32 %v1617_v5, %v865_v7  ;;  %v943_v5 = vadd.f32 %v1619_v55, %v936_v16  ;;  %v2698_v55 = vld [vmem:[#allocation2 + $0xb0] sm:$0xff] }
 0x4d5   :  { %v867_v13 = vpop.f32.mrf.mxu0  ;;  %v938_v57 = vpop.f32.mrf.mxu1 }
 0x4d6   :  { %v1621_v14 = vmul.f32 -1.442695, %v941_v12  ;;  %v942_v15 = vadd.f32 %v1618_v10, %v867_v13  ;;  %v944_v9 = vadd.f32 %v1620_v19, %v938_v57 }
 0x4d8   :  { %1767 = vpow2.f32 %v1621_v14  ;;  %v1622_v17 = vmul.f32 -1.442695, %v942_v15  ;;  %v1623_v62 = vmul.f32 -1.442695, %v944_v9 }
 0x4da   :  { %1769 = vpow2.f32 %v1622_v17 }
 0x4db   :  { %1771 = vpow2.f32 %v1623_v62  ;;  %v2702_v62 = vld [vmem:[#allocation2 + $0x98] sm:$0xff] }
 0x4e5   :  { %v1768_v3 = vpop.eup %1767 }
 0x4e6   :  { %v948_v7 = vadd.f32 1.0, %v1768_v3 }
 0x4e7   :  { %v1770_v12 = vpop.eup %1769 }
 0x4e8   :  { %1773 = vrcp.f32 %v948_v7  ;;  %v954_v10 = vadd.f32 1.0, %v1770_v12  ;;  %v1772_v13 = vpop.eup %1771  ;;  %v2710_v7 = vld [vmem:[#allocation2 + $0x78] sm:$0xff]  ;;  %v2714_v12 = vld [vmem:[#allocation2 + $0x70] sm:$0xff] }
 0x4e9   :  { %1775 = vtanh.f32 %v943_v5  ;;  %v961_v20 = vadd.f32 1.0, %v1772_v13  ;;  %v2706_v5 = vld [vmem:[#allocation2 + $0x90] sm:$0xff]  ;;  %3084 = vst [vmem:[#allocation18_spill] sm:$0xff] %v2710_v7  ;;  %3085 = vst [vmem:[#allocation10_spill] sm:$0xff] %v2714_v12 }
 0x4ea   :  { %1777 = vrcp.f32 %v954_v10  ;;  %v2718_v10 = vld [vmem:[#allocation2 + $0x58] sm:$0xff]  ;;  %v2722_v13 = vld [vmem:[#allocation2 + $0x50] sm:$0xff] }
 0x4eb   :  { %1779 = vrcp.f32 %v961_v20  ;;  %v2690_v20 = vld [vmem:[#allocation2 + $0xd0] sm:$0xff]  ;;  %3086 = vst [vmem:[#allocation19_spill] sm:$0xff] %v2718_v10  ;;  %3087 = vst [vmem:[#allocation11_spill] sm:$0xff] %v2722_v13 }
 0x4f5   :  { %v1774_v14 = vpop.eup %1773 }
 0x4f6   :  { %v1776_v15 = vpop.eup %1775 }
 0x4f7   :  { %v1778_v17 = vpop.eup %1777  ;;  %v965_v19 = vmul.f32 %v1776_v15, %v1774_v14  ;;  %v2726_v14 = vld [vmem:[#allocation2 + $0x38] sm:$0xff]  ;;  %v2729_v15 = vld [vmem:[#allocation2 + $0x20] sm:$0xff] }
 0x4f8   :  { %v964_v57 = vmul.f32 %v1778_v17, %v2474_v63  ;;  %v1780_v3 = vpop.eup %1779  ;;  %v2694_v63 = vld [vmem:[#allocation2 + $0xb8] sm:$0xff]  ;;  %3088 = vst [vmem:[#allocation20_spill] sm:$0xff] %v2726_v14  ;;  %3089 = vst [vmem:[#allocation13_spill] sm:$0xff] %v2729_v15  ;;  %v2732_v17 = vld [vmem:[#allocation2 + $0x30] sm:$0xff] }
 0x4f9   :  { %3090 = vst [vmem:[#allocation21_spill] sm:$0xff] %v2732_v17 }
 0x4fa   :  { %v2650_v18 = vadd.f32 %v965_v19, %v964_v57  ;;  %v2735_v19 = vld [vmem:[#allocation2 + $0x8] sm:$0xff]  ;;  %v2738_v57 = vld [vmem:[#allocation2 + $0x18] sm:$0xff] }
 0x4fb   :  { %3091 = vst [vmem:[#allocation15_spill] sm:$0xff] %v2735_v19  ;;  %3092 = vst [vmem:[#allocation22_spill] sm:$0xff] %v2738_v57 }
 0x4fc   :  { %1781 = vtanh.f32 %v2650_v18 }
 0x509   :  { %v1782_v16 = vpop.eup %1781 }
 0x50a   :  { %v968_v9 = vmul.f32 %v1782_v16, %v1780_v3  ;;  %v2741_v3 = vld [vmem:[#allocation2] sm:$0xff]  ;;  %v3094_v16 = vmov 0.0  }
 0x50b   :  { %3093 = vst [vmem:[#allocation17_spill] sm:$0xff] %v2741_v3 }
 0x50c   :  { %1039 = vmatmul.mubr.f32.vlgmr.msra.gmra.mxu0 %v968_v9  ;;  %1110 = vmatmul.mubr.f32.vlgmr.msra.gmra.mxu1 %v968_v9  ;;  %v2745_v9 = vld [vmem:[#allocation2 + $0x10] sm:$0xff] }
 0x50d   :  { %1150 = vmatpush1.msra.mxu0 %v2477_v1  ;;  %1221 = vmatpush1.msra.mxu1 %v2480_v56  ;;  %3095 = vst [vmem:[#allocation23_spill] sm:$0xff] %v2745_v9 }
 0x50e   :  { %1151 = vmatprep.subr.mxu0 %v2483_v58  ;;  %1222 = vmatprep.subr.mxu1 %v2486_v53 }
 0x50f   :  { %1152 = vmatpush1.msra.mxu0 %v2489_v59  ;;  %1223 = vmatpush1.msra.mxu1 %v2492_v0 }
 0x510   :  { %1153 = vmatprep.subr.mxu0 %v2495_v52  ;;  %1224 = vmatprep.subr.mxu1 %v2498_v60 }
 0x511   :  { %1154 = vmatpush1.msra.mxu0 %v2501_v48  ;;  %1225 = vmatpush1.msra.mxu1 %v2504_v50 }
 0x512   :  { %1155 = vmatprep.subr.mxu0 %v2507_v2  ;;  %1226 = vmatprep.subr.mxu1 %v2510_v4 }
 0x513   :  { %1156 = vmatpush1.msra.mxu0 %v2513_v6  ;;  %1227 = vmatpush1.msra.mxu1 %v2516_v8 }
 0x514   :  { %1157 = vmatprep.subr.mxu0 %v2519_v11  ;;  %1228 = vmatprep.subr.mxu1 %v2522_v21 }
 0x515   :  { %1158 = vmatpush1.msra.mxu0 %v2525_v22  ;;  %1229 = vmatpush1.msra.mxu1 %v2528_v23 }
 0x516   :  { %1159 = vmatprep.subr.mxu0 %v2531_v24  ;;  %1230 = vmatprep.subr.mxu1 %v2534_v25 }
 0x517   :  { %1160 = vmatpush1.msra.mxu0 %v2537_v26  ;;  %1231 = vmatpush1.msra.mxu1 %v2540_v27 }
 0x518   :  { %1161 = vmatprep.subr.mxu0 %v2543_v28  ;;  %1232 = vmatprep.subr.mxu1 %v2546_v29 }
 0x519   :  { %1162 = vmatpush1.msra.mxu0 %v2549_v30  ;;  %1233 = vmatpush1.msra.mxu1 %v2552_v31 }
 0x51a   :  { %1163 = vmatprep.subr.mxu0 %v2555_v32  ;;  %1234 = vmatprep.subr.mxu1 %v2558_v33 }
 0x51b   :  { %1164 = vmatpush1.msra.mxu0 %v2561_v34  ;;  %1235 = vmatpush1.msra.mxu1 %v2564_v35 }
 0x51c   :  { %1165 = vmatprep.subr.mxu0 %v2567_v36  ;;  %1236 = vmatprep.subr.mxu1 %v2570_v37 }
 0x51d   :  { %1166 = vmatpush1.msra.mxu0 %v2573_v38  ;;  %1237 = vmatpush1.msra.mxu1 %v2576_v39 }
 0x51e   :  { %1167 = vmatprep.subr.mxu0 %v2579_v40  ;;  %1238 = vmatprep.subr.mxu1 %v2582_v41 }
 0x51f   :  { %1168 = vmatpush1.msra.mxu0 %v2585_v42  ;;  %1239 = vmatpush1.msra.mxu1 %v2690_v20 }
 0x520   :  { %1169 = vmatprep.subr.mxu0 %v2589_v43  ;;  %1240 = vmatprep.subr.mxu1 %v2694_v63 }
 0x521   :  { %1170 = vmatpush1.msra.mxu0 %v2593_v46  ;;  %1241 = vmatpush1.msra.mxu1 %v2698_v55 }
 0x522   :  { %1171 = vmatprep.subr.mxu0 %v2597_v54  ;;  %1242 = vmatprep.subr.mxu1 %v2702_v62 }
 0x523   :  { %1172 = vmatpush1.msra.mxu0 %v2601_v61  ;;  %1243 = vmatpush1.msra.mxu1 %v2706_v5 }
 0x524   :  { %1173 = vmatprep.subr.mxu0 %v2605_v45  ;;  %1244 = vmatprep.subr.mxu1 %v2710_v7 }
 0x525   :  { %1174 = vmatpush1.msra.mxu0 %v2609_v47  ;;  %1245 = vmatpush1.msra.mxu1 %v2714_v12 }
 0x526   :  { %1175 = vmatprep.subr.mxu0 %v2613_v49  ;;  %1246 = vmatprep.subr.mxu1 %v2718_v10  ;;  %v1626_v49 = vld [vmem:[%s2931_s0 + $0xb0] sm:$0xff] }
 0x527   :  { %1176 = vmatpush1.msra.mxu0 %v2617_v51  ;;  %1247 = vmatpush1.msra.mxu1 %v2722_v13 }
 0x528   :  { %1177 = vmatprep.subr.mxu0 %v2621_v44  ;;  %1248 = vmatprep.subr.mxu1 %v2726_v14 }
 0x529   :  { %1178 = vmatpush1.msra.mxu0 %v2729_v15  ;;  %1249 = vmatpush1.msra.mxu1 %v2732_v17  ;;  %v3096_v17 = vld [vmem:[#allocation12_spill] sm:$0xff]  ;;  %v3097_v15 = vld [vmem:[#allocation9_spill] sm:$0xff] }
 0x52a   :  { %1179 = vmatprep.subr.mxu0 %v2735_v19  ;;  %1250 = vmatprep.subr.mxu1 %v2738_v57  ;;  %v1624_v57 = vld [vmem:[%s2931_s0 + $0xa0] sm:$0xff] }
 0x52b   :  { %1180 = vmatpush1.msra.mxu0 %v2741_v3  ;;  %1213 = vmatprep.mubr.f32.mxu0 %v3094_v16  ;;  %v1625_v3 = vld [vmem:[%s2931_s0 + $0xa8] sm:$0xff] }
 0x52c   :  { %1251 = vmatpush1.msra.mxu1 %v2745_v9  ;;  %1284 = vmatprep.mubr.f32.mxu1 %v3094_v16 }
 0x52d   :  { %1324 = vmatprep.subr.mxu0 %v3096_v17  ;;  %1395 = vmatprep.subr.mxu1 %v3097_v15  ;;  %v1627_v15 = vld [vmem:[%s2931_s0 + $0xb8] sm:$0xff] }
 0x5cc   :  { %v1040_v19 = vpop.f32.mrf.mxu0  ;;  %v1111_v9 = vpop.f32.mrf.mxu1 }
 0x5cd   :  { %v1116_v14 = vadd.f32 %v1624_v57, %v1040_v19  ;;  %v1118_v19 = vadd.f32 %v1626_v49, %v1111_v9  ;;  %v1506_v9 = vld [vmem:[%s2933_s2 + $0x60] sm:$0xff] }
 0x5ce   :  { %v1042_v44 = vpop.f32.mrf.mxu0  ;;  %v1113_v17 = vpop.f32.mrf.mxu1 }
 0x5cf   :  { %v1628_v13 = vmul.f32 -1.442695, %v1116_v14  ;;  %v1117_v51 = vadd.f32 %v1625_v3, %v1042_v44  ;;  %v1119_v10 = vadd.f32 %v1627_v15, %v1113_v17 }
 0x5d1   :  { %1783 = vpow2.f32 %v1628_v13  ;;  %v1629_v16 = vmul.f32 -1.442695, %v1117_v51  ;;  %v1630_v12 = vmul.f32 -1.442695, %v1119_v10  ;;  %v1507_v10 = vld [vmem:[%s2933_s2 + $0x68] sm:$0xff] }
 0x5d3   :  { %1785 = vpow2.f32 %v1629_v16 }
 0x5d4   :  { %1787 = vpow2.f32 %v1630_v12 }
 0x5de   :  { %v1784_v47 = vpop.eup %1783 }
 0x5df   :  { %v1123_v57 = vadd.f32 1.0, %v1784_v47 }
 0x5e0   :  { %v1786_v14 = vpop.eup %1785 }
 0x5e1   :  { %1789 = vrcp.f32 %v1123_v57  ;;  %v1129_v44 = vadd.f32 1.0, %v1786_v14  ;;  %v1788_v51 = vpop.eup %1787  ;;  %v1504_v57 = vld [vmem:[%s2933_s2 + $0x50] sm:$0xff]  ;;  %v1503_v14 = vld [vmem:[%s2933_s2 + $0x48] sm:$0xff] }
 0x5e2   :  { %1791 = vtanh.f32 %v1118_v19  ;;  %v1136_v7 = vadd.f32 1.0, %v1788_v51  ;;  %v1505_v19 = vld [vmem:[%s2933_s2 + $0x58] sm:$0xff] }
 0x5e3   :  { %1793 = vrcp.f32 %v1129_v44  ;;  %v1502_v44 = vld [vmem:[%s2933_s2 + $0x40] sm:$0xff]  ;;  %v1501_v51 = vld [vmem:[%s2933_s2 + $0x38] sm:$0xff] }
 0x5e4   :  { %1795 = vrcp.f32 %v1136_v7  ;;  %v1509_v7 = vld [vmem:[%s2933_s2 + $0x78] sm:$0xff] }
 0x5ee   :  { %v1790_v13 = vpop.eup %1789 }
 0x5ef   :  { %v1792_v3 = vpop.eup %1791 }
 0x5f0   :  { %v1794_v16 = vpop.eup %1793  ;;  %v1140_v15 = vmul.f32 %v1792_v3, %v1790_v13  ;;  %v1500_v13 = vld [vmem:[%s2933_s2 + $0x30] sm:$0xff]  ;;  %v1499_v3 = vld [vmem:[%s2933_s2 + $0x28] sm:$0xff] }
 0x5f1   :  { %v1139_v17 = vmul.f32 %v1794_v16, %v2650_v18  ;;  %v1796_v47 = vpop.eup %1795  ;;  %v3098_v18 = vld [vmem:[#allocation5_spill] sm:$0xff] }
 0x5f2   :  { %v1498_v16 = vld [vmem:[%s2933_s2 + $0x20] sm:$0xff] }
 0x5f3   :  { %v2764_v45 = vadd.f32 %v1140_v15, %v1139_v17  ;;  %v1497_v15 = vld [vmem:[%s2933_s2 + $0x18] sm:$0xff]  ;;  %v1496_v17 = vld [vmem:[%s2933_s2 + $0x10] sm:$0xff] }
 0x5f5   :  { %1797 = vtanh.f32 %v2764_v45 }
 0x602   :  { %v1798_v49 = vpop.eup %1797 }
 0x603   :  { %v1143_v12 = vmul.f32 %v1798_v49, %v1796_v47  ;;  %v1495_v47 = vld [vmem:[%s2933_s2 + $0x8] sm:$0xff]  ;;  %v1494_v49 = vld [vmem:[%s2933_s2] sm:$0xff] }
 0x605   :  { %1214 = vmatmul.mubr.f32.vlgmr.msra.gmra.mxu0 %v1143_v12  ;;  %1285 = vmatmul.mubr.f32.vlgmr.msra.gmra.mxu1 %v1143_v12  ;;  %v1638_v12 = vld [vmem:[%s2931_s0 + $0xe0] sm:$0xff] }
 0x606   :  { %1325 = vmatpush1.msra.mxu0 %v2477_v1  ;;  %1396 = vmatpush1.msra.mxu1 %v2480_v56  ;;  %v3099_v1 = vld [vmem:[#allocation18_spill] sm:$0xff]  ;;  %v3100_v56 = vld [vmem:[#allocation7_spill] sm:$0xff] }
 0x607   :  { %1326 = vmatprep.subr.mxu0 %v2483_v58  ;;  %1397 = vmatprep.subr.mxu1 %v2486_v53  ;;  %v3101_v58 = vld [vmem:[#allocation10_spill] sm:$0xff] }
 0x608   :  { %1327 = vmatpush1.msra.mxu0 %v2489_v59  ;;  %1398 = vmatpush1.msra.mxu1 %v2492_v0  ;;  %v3102_v53 = vld [vmem:[#allocation14_spill] sm:$0xff]  ;;  %v3103_v59 = vld [vmem:[#allocation19_spill] sm:$0xff]  ;;  %v3104_v0 = vld [vmem:[#allocation8_spill] sm:$0xff] }
 0x609   :  { %1328 = vmatprep.subr.mxu0 %v2495_v52  ;;  %1399 = vmatprep.subr.mxu1 %v2498_v60  ;;  %v3105_v52 = vld [vmem:[#allocation11_spill] sm:$0xff]  ;;  %v3106_v60 = vld [vmem:[#allocation16_spill] sm:$0xff] }
 0x60a   :  { %1329 = vmatpush1.msra.mxu0 %v2501_v48  ;;  %1400 = vmatpush1.msra.mxu1 %v2504_v50  ;;  %v3107_v48 = vld [vmem:[#allocation20_spill] sm:$0xff]  ;;  %v3108_v50 = vld [vmem:[#allocation13_spill] sm:$0xff] }
 0x60b   :  { %1330 = vmatprep.subr.mxu0 %v2507_v2  ;;  %1401 = vmatprep.subr.mxu1 %v2510_v4  ;;  %v3109_v2 = vld [vmem:[#allocation21_spill] sm:$0xff]  ;;  %v3110_v4 = vld [vmem:[#allocation15_spill] sm:$0xff] }
 0x60c   :  { %1331 = vmatpush1.msra.mxu0 %v2513_v6  ;;  %1402 = vmatpush1.msra.mxu1 %v2516_v8  ;;  %v3111_v6 = vld [vmem:[#allocation22_spill] sm:$0xff]  ;;  %v3112_v8 = vld [vmem:[#allocation17_spill] sm:$0xff] }
 0x60d   :  { %1332 = vmatprep.subr.mxu0 %v2519_v11  ;;  %1403 = vmatprep.subr.mxu1 %v2522_v21  ;;  %v3113_v11 = vmov 0.0   ;;  %v3114_v21 = vld [vmem:[#allocation23_spill] sm:$0xff] }
 0x60e   :  { %1333 = vmatpush1.msra.mxu0 %v2525_v22  ;;  %1404 = vmatpush1.msra.mxu1 %v2528_v23  ;;  %v1631_v22 = vld [vmem:[%s2931_s0 + $0xc0] sm:$0xff] }
 0x60f   :  { %1334 = vmatprep.subr.mxu0 %v2531_v24  ;;  %1405 = vmatprep.subr.mxu1 %v2534_v25  ;;  %v1632_v24 = vld [vmem:[%s2931_s0 + $0xc8] sm:$0xff] }
 0x610   :  { %1335 = vmatpush1.msra.mxu0 %v2537_v26  ;;  %1406 = vmatpush1.msra.mxu1 %v2540_v27 }
 0x611   :  { %1336 = vmatprep.subr.mxu0 %v2543_v28  ;;  %1407 = vmatprep.subr.mxu1 %v2546_v29 }
 0x612   :  { %1337 = vmatpush1.msra.mxu0 %v2549_v30  ;;  %1408 = vmatpush1.msra.mxu1 %v2552_v31  ;;  %v1634_v31 = vld [vmem:[%s2931_s0 + $0xd8] sm:$0xff] }
 0x613   :  { %1338 = vmatprep.subr.mxu0 %v2555_v32  ;;  %1409 = vmatprep.subr.mxu1 %v2558_v33 }
 0x614   :  { %1339 = vmatpush1.msra.mxu0 %v2561_v34  ;;  %1410 = vmatpush1.msra.mxu1 %v2564_v35  ;;  %v1633_v34 = vld [vmem:[%s2931_s0 + $0xd0] sm:$0xff] }
 0x615   :  { %1340 = vmatprep.subr.mxu0 %v2567_v36  ;;  %1411 = vmatprep.subr.mxu1 %v2570_v37 }
 0x616   :  { %1341 = vmatpush1.msra.mxu0 %v2573_v38  ;;  %1412 = vmatpush1.msra.mxu1 %v2576_v39 }
 0x617   :  { %1342 = vmatprep.subr.mxu0 %v2579_v40  ;;  %1413 = vmatprep.subr.mxu1 %v2582_v41 }
 0x618   :  { %1343 = vmatpush1.msra.mxu0 %v2585_v42  ;;  %1414 = vmatpush1.msra.mxu1 %v2690_v20 }
 0x619   :  { %1344 = vmatprep.subr.mxu0 %v2589_v43  ;;  %1415 = vmatprep.subr.mxu1 %v2694_v63 }
 0x61a   :  { %1345 = vmatpush1.msra.mxu0 %v2593_v46  ;;  %1416 = vmatpush1.msra.mxu1 %v2698_v55 }
 0x61b   :  { %1346 = vmatprep.subr.mxu0 %v2597_v54  ;;  %1417 = vmatprep.subr.mxu1 %v2702_v62 }
 0x61c   :  { %1347 = vmatpush1.msra.mxu0 %v2601_v61  ;;  %1418 = vmatpush1.msra.mxu1 %v2706_v5 }
 0x61d   :  { %1348 = vmatprep.subr.mxu0 %v3098_v18  ;;  %1419 = vmatprep.subr.mxu1 %v3099_v1  ;;  %v1639_v1 = vld [vmem:[%s2931_s0 + $0xe8] sm:$0xff] }
 0x61e   :  { %1349 = vmatpush1.msra.mxu0 %v3100_v56  ;;  %1420 = vmatpush1.msra.mxu1 %v3101_v58 }
 0x61f   :  { %1350 = vmatprep.subr.mxu0 %v3102_v53  ;;  %1421 = vmatprep.subr.mxu1 %v3103_v59 }
 0x620   :  { %1351 = vmatpush1.msra.mxu0 %v3104_v0  ;;  %1422 = vmatpush1.msra.mxu1 %v3105_v52 }
 0x621   :  { %1352 = vmatprep.subr.mxu0 %v3106_v60  ;;  %1423 = vmatprep.subr.mxu1 %v3107_v48  ;;  %v1641_v60 = vld [vmem:[%s2931_s0 + $0xf8] sm:$0xff] }
 0x622   :  { %1353 = vmatpush1.msra.mxu0 %v3108_v50  ;;  %1424 = vmatpush1.msra.mxu1 %v3109_v2  ;;  %v1640_v2 = vld [vmem:[%s2931_s0 + $0xf0] sm:$0xff] }
 0x623   :  { %1354 = vmatprep.subr.mxu0 %v3110_v4  ;;  %1425 = vmatprep.subr.mxu1 %v3111_v6 }
 0x624   :  { %1355 = vmatpush1.msra.mxu0 %v3112_v8  ;;  %1388 = vmatprep.mubr.f32.mxu0 %v3113_v11 }
 0x625   :  { %1426 = vmatpush1.msra.mxu1 %v3114_v21  ;;  %1459 = vmatprep.mubr.f32.mxu1 %v3113_v11 }
 0x626   :  { %1663 = vmatprep.subr.mxu0 %v3113_v11 }
 0x6c5   :  { %v1215_v23 = vpop.f32.mrf.mxu0  ;;  %v1286_v29 = vpop.f32.mrf.mxu1 }
 0x6c6   :  { %v1291_v25 = vadd.f32 %v1631_v22, %v1215_v23  ;;  %v1293_v37 = vadd.f32 %v1633_v34, %v1286_v29  ;;  %v1645_v34 = vld [vmem:[%s2934_s3] ss:$0 sm:$0xff] }
 0x6c7   :  { %v1217_v26 = vpop.f32.mrf.mxu0  ;;  %v1288_v32 = vpop.f32.mrf.mxu1 }
 0x6c8   :  { %v1635_v27 = vmul.f32 -1.442695, %v1291_v25  ;;  %v1292_v28 = vadd.f32 %v1632_v24, %v1217_v26  ;;  %v1294_v33 = vadd.f32 %v1634_v31, %v1288_v32 }
 0x6ca   :  { %1799 = vpow2.f32 %v1635_v27  ;;  %v1636_v30 = vmul.f32 -1.442695, %v1292_v28  ;;  %v1637_v35 = vmul.f32 -1.442695, %v1294_v33 }
 0x6cc   :  { %1801 = vpow2.f32 %v1636_v30 }
 0x6cd   :  { %1803 = vpow2.f32 %v1637_v35 }
 0x6d7   :  { %v1800_v36 = vpop.eup %1799 }
 0x6d8   :  { %v1298_v38 = vadd.f32 1.0, %v1800_v36 }
 0x6d9   :  { %v1802_v39 = vpop.eup %1801 }
 0x6da   :  { %1805 = vrcp.f32 %v1298_v38  ;;  %v1304_v40 = vadd.f32 1.0, %v1802_v39  ;;  %v1804_v41 = vpop.eup %1803 }
 0x6db   :  { %1807 = vtanh.f32 %v1293_v37  ;;  %v1311_v54 = vadd.f32 1.0, %v1804_v41 }
 0x6dc   :  { %1809 = vrcp.f32 %v1304_v40 }
 0x6dd   :  { %1811 = vrcp.f32 %v1311_v54 }
 0x6e7   :  { %v1806_v42 = vpop.eup %1805 }
 0x6e8   :  { %v1808_v43 = vpop.eup %1807 }
 0x6e9   :  { %v1810_v46 = vpop.eup %1809  ;;  %v1315_v61 = vmul.f32 %v1808_v43, %v1806_v42 }
 0x6ea   :  { %v1314_v20 = vmul.f32 %v1810_v46, %v2764_v45  ;;  %v1812_v55 = vpop.eup %1811  ;;  %v1508_v45 = vld [vmem:[%s2933_s2 + $0x70] sm:$0xff] }
 0x6ec   :  { %v2845_v63 = vadd.f32 %v1315_v61, %v1314_v20 }
 0x6ee   :  { %1813 = vtanh.f32 %v2845_v63 }
 0x6fb   :  { %v1814_v62 = vpop.eup %1813 }
 0x6fc   :  { %v1318_v5 = vmul.f32 %v1814_v62, %v1812_v55 }
 0x6fe   :  { %1389 = vmatmul.mubr.f32.vlgmr.msra.gmra.mxu0 %v1318_v5  ;;  %1460 = vmatmul.mubr.f32.vlgmr.msra.gmra.mxu1 %v1318_v5 }
 0x6ff   :  { %1664 = vmatpush3.msra.mxu0 %v1509_v7  ;;  %1695 = vmatprep.mubr.msk.f32.mxu0 %vm1921_vm0, %v3113_v11 }
 0x700   :  { %1665 = vmatprep.subr.mxu0 %v3113_v11 }
 0x701   :  { %1666 = vmatpush3.msra.mxu0 %v1508_v45 }
 0x702   :  { %1667 = vmatprep.subr.mxu0 %v3113_v11 }
 0x703   :  { %1668 = vmatpush3.msra.mxu0 %v1507_v10 }
 0x704   :  { %1669 = vmatprep.subr.mxu0 %v3113_v11 }
 0x705   :  { %1670 = vmatpush3.msra.mxu0 %v1506_v9 }
 0x706   :  { %1671 = vmatprep.subr.mxu0 %v3113_v11 }
 0x707   :  { %1672 = vmatpush3.msra.mxu0 %v1505_v19 }
 0x708   :  { %1673 = vmatprep.subr.mxu0 %v3113_v11 }
 0x709   :  { %1674 = vmatpush3.msra.mxu0 %v1504_v57 }
 0x70a   :  { %1675 = vmatprep.subr.mxu0 %v3113_v11 }
 0x70b   :  { %1676 = vmatpush3.msra.mxu0 %v1503_v14 }
 0x70c   :  { %1677 = vmatprep.subr.mxu0 %v3113_v11 }
 0x70d   :  { %1678 = vmatpush3.msra.mxu0 %v1502_v44 }
 0x70e   :  { %1679 = vmatprep.subr.mxu0 %v3113_v11 }
 0x70f   :  { %1680 = vmatpush3.msra.mxu0 %v1501_v51 }
 0x710   :  { %1681 = vmatprep.subr.mxu0 %v3113_v11 }
 0x711   :  { %1682 = vmatpush3.msra.mxu0 %v1500_v13 }
 0x712   :  { %1683 = vmatprep.subr.mxu0 %v3113_v11 }
 0x713   :  { %1684 = vmatpush3.msra.mxu0 %v1499_v3 }
 0x714   :  { %1685 = vmatprep.subr.mxu0 %v3113_v11 }
 0x715   :  { %1686 = vmatpush3.msra.mxu0 %v1498_v16 }
 0x716   :  { %1687 = vmatprep.subr.mxu0 %v3113_v11 }
 0x717   :  { %1688 = vmatpush3.msra.mxu0 %v1497_v15 }
 0x718   :  { %1689 = vmatprep.subr.mxu0 %v3113_v11 }
 0x719   :  { %1690 = vmatpush3.msra.mxu0 %v1496_v17 }
 0x71a   :  { %1691 = vmatprep.subr.mxu0 %v3113_v11 }
 0x71b   :  { %1692 = vmatpush3.msra.mxu0 %v1495_v47 }
 0x71c   :  { %1693 = vmatprep.subr.mxu0 %v3113_v11 }
 0x71d   :  { %1694 = vmatpush3.msra.mxu0 %v1494_v49 }
 0x7be   :  { %v1390_v18 = vpop.f32.mrf.mxu0  ;;  %v1461_v0 = vpop.f32.mrf.mxu1 }
 0x7bf   :  { %v1466_v56 = vadd.f32 %v1638_v12, %v1390_v18  ;;  %v1468_v8 = vadd.f32 %v1640_v2, %v1461_v0 }
 0x7c0   :  { %v1392_v58 = vpop.f32.mrf.mxu0  ;;  %v1463_v48 = vpop.f32.mrf.mxu1 }
 0x7c1   :  { %v1642_v53 = vmul.f32 -1.442695, %v1466_v56  ;;  %v1467_v59 = vadd.f32 %v1639_v1, %v1392_v58  ;;  %v1469_v50 = vadd.f32 %v1641_v60, %v1463_v48 }
 0x7c3   :  { %1815 = vpow2.f32 %v1642_v53  ;;  %v1643_v52 = vmul.f32 -1.442695, %v1467_v59  ;;  %v1644_v4 = vmul.f32 -1.442695, %v1469_v50 }
 0x7c5   :  { %1817 = vpow2.f32 %v1643_v52 }
 0x7c6   :  { %1819 = vpow2.f32 %v1644_v4 }
 0x7d0   :  { %v1816_v6 = vpop.eup %1815 }
 0x7d1   :  { %v1473_v11 = vadd.f32 1.0, %v1816_v6 }
 0x7d2   :  { %v1818_v21 = vpop.eup %1817 }
 0x7d3   :  { %1821 = vrcp.f32 %v1473_v11  ;;  %v1479_v22 = vadd.f32 1.0, %v1818_v21  ;;  %v1820_v23 = vpop.eup %1819 }
 0x7d4   :  { %1823 = vtanh.f32 %v1468_v8  ;;  %v1486_v27 = vadd.f32 1.0, %v1820_v23 }
 0x7d5   :  { %1825 = vrcp.f32 %v1479_v22 }
 0x7d6   :  { %1827 = vrcp.f32 %v1486_v27 }
 0x7e0   :  { %v1822_v24 = vpop.eup %1821 }
 0x7e1   :  { %v1824_v25 = vpop.eup %1823 }
 0x7e2   :  { %v1826_v26 = vpop.eup %1825  ;;  %v1490_v28 = vmul.f32 %v1824_v25, %v1822_v24 }
 0x7e3   :  { %v1489_v29 = vmul.f32 %v1826_v26, %v2845_v63  ;;  %v1828_v31 = vpop.eup %1827 }
 0x7e5   :  { %v1491_v30 = vadd.f32 %v1490_v28, %v1489_v29 }
 0x7e7   :  { %1829 = vtanh.f32 %v1491_v30 }
 0x7f4   :  { %v1830_v32 = vpop.eup %1829 }
 0x7f5   :  { %v1493_v33 = vmul.f32 %v1830_v32, %v1828_v31 }
 0x7f7   :  { %1696 = vmatmul.mubr.f32.vlgmr.msra.gmra.mxu0 %v1493_v33 }
 0x8b7   :  { %v1583_v35 = vpop.f32.mrf.mxu0 }
 0x8b8   :  { %v1584_v36 = vadd.f32 %v1645_v34, %v1583_v35 }
 0x8b9   :  { %v1697_v37 = vpop.f32.mrf.mxu0 }
 0x8ba   :  { %1587 = vst [vmem:[%s2935_s4] sm:$0xff] %v1584_v36 }
 0x8bb   :  { %1592 = vsyncpa [#allocation3], 1 }

</bundles_post_ra>
